<compile_context>
chip_gen: v6e
topology: v6e:2x2x1
jax: 0.10.0
libtpu: 0.0.40
codegen_flags: <defaults>
</compile_context>

<pallas_src>
import functools
import math

import jax
import jax.numpy as jnp
from jax.experimental import pallas as pl
from jax.experimental.pallas import tpu as pltpu

EPS = 1e-5
LANE = 128
VMEM_LIMIT_BYTES = 48 * 1024 * 1024   # > default scoped limit on v5e/v6e/v7x, < physical on all

defaultcfg = {101: [64, 64, 64, 256, 64, 64, 256, 64, 64, 256, 128, 128, 512, 128, 128,
                    512, 128, 128, 512, 128, 128, 512, 256, 256, 1024, 256, 256, 1024,
                    256, 256, 1024, 256, 256, 1024, 256, 256, 1024, 256, 256, 1024, 256,
                    256, 1024, 256, 256, 1024, 256, 256, 1024, 256, 256, 1024, 256, 256,
                    1024, 256, 256, 1024, 256, 256, 1024, 256, 256, 1024, 256, 256, 1024,
                    256, 256, 1024, 256, 256, 1024, 256, 256, 1024, 256, 256, 1024, 256,
                    256, 1024, 256, 256, 1024, 256, 256, 1024, 256, 256, 1024, 512, 512,
                    2048, 512, 512, 2048, 512, 512, 2048]}

# (cfg start index, number of blocks, stride of first (downsample) block)
LAYER_DEFS = ((0, 3, 1), (9, 4, 2), (21, 23, 2), (90, 3, 2))


# ------------------------------------------------------------------ small helpers

def _round_up(x, m):
    return (x + m - 1) // m * m


def _cpad(c):
    return _round_up(c, LANE)


def _pick_tile(dim, prefs):
    for t in prefs:
        if dim % t == 0:
            return t
    return dim


# ------------------------------------------------------------------ Pallas kernels
# Generic fused  [M,K]@[K,N]  + BatchNorm(batch stats) + [residual] + ReLU,
# grid = (N_tiles, K_tiles); K accumulated into a f32 VMEM scratch.

def _mm_accumulate(p_ref, w_ref, acc_ref):
    @pl.when(pl.program_id(1) == 0)
    def _init():
        acc_ref[...] = jnp.zeros_like(acc_ref)

    acc_ref[...] += jnp.dot(p_ref[...], w_ref[...],
                            preferred_element_type=jnp.float32)


def _bn_apply(x, g, b):
    mean = jnp.mean(x, axis=0, keepdims=True)                    # batch statistics
    var = jnp.mean(jnp.square(x - mean), axis=0, keepdims=True)  # biased variance
    return g * (x - mean) * jax.lax.rsqrt(var + EPS) + b


def _mm_bn_relu_kernel(p_ref, w_ref, g_ref, b_ref, o_ref, acc_ref):
    _mm_accumulate(p_ref, w_ref, acc_ref)

    @pl.when(pl.program_id(1) == pl.num_programs(1) - 1)
    def _fin():
        y = _bn_apply(acc_ref[...], g_ref[...], b_ref[...])
        o_ref[...] = jnp.maximum(y, 0.0).astype(o_ref.dtype)


def _mm_bn_add_relu_kernel(p_ref, w_ref, g_ref, b_ref, r_ref, o_ref, acc_ref):
    _mm_accumulate(p_ref, w_ref, acc_ref)

    @pl.when(pl.program_id(1) == pl.num_programs(1) - 1)
    def _fin():
        y = _bn_apply(acc_ref[...], g_ref[...], b_ref[...])
        y = y + r_ref[...].astype(jnp.float32)
        o_ref[...] = jnp.maximum(y, 0.0).astype(o_ref.dtype)


def _mm_plain_kernel(p_ref, w_ref, o_ref, acc_ref):
    # downsample branch: conv only (no BN / no ReLU in the PyTorch module)
    _mm_accumulate(p_ref, w_ref, acc_ref)

    @pl.when(pl.program_id(1) == pl.num_programs(1) - 1)
    def _fin():
        o_ref[...] = acc_ref[...].astype(o_ref.dtype)


def _conv3x3_direct_kernel(x_ref, w_ref, g_ref, b_ref, mask_ref, o_ref, acc_ref,
                           *, wp, m_wide, inv_count):
    # Direct stride-1 3x3 conv: x_ref is the spatially padded input flattened to
    # [M_ext, Cin_tile]; the 9 taps are shifted row windows of it.  Output rows are in
    # "wide" (padded) order; BN statistics are masked to the valid rows.
    kc = pl.program_id(1)

    @pl.when(kc == 0)
    def _init():
        acc_ref[...] = jnp.zeros_like(acc_ref)

    x = x_ref[...].astype(jnp.float32)            # [M_ext, tc] (f32 for cheap row shifts)
    part = None
    for t in range(9):
        off = (t // 3) * wp + (t % 3)
        xt = jax.lax.slice_in_dim(x, off, off + m_wide, axis=0).astype(jnp.bfloat16)
        d = jnp.dot(xt, w_ref[t], preferred_element_type=jnp.float32)
        part = d if part is None else part + d
    acc_ref[...] += part

    @pl.when(kc == pl.num_programs(1) - 1)
    def _fin():
        acc = acc_ref[...]                        # [M_wide, tn] f32
        mask = mask_ref[...]                      # [M_wide, 1]  f32 (1 on valid rows)
        mean = jnp.sum(acc * mask, axis=0, keepdims=True) * inv_count
        cent = (acc - mean) * mask
        var = jnp.sum(cent * cent, axis=0, keepdims=True) * inv_count
        y = g_ref[...] * (acc - mean) * jax.lax.rsqrt(var + EPS) + b_ref[...]
        o_ref[...] = jnp.maximum(y, 0.0).astype(o_ref.dtype)


def _pool_fc_kernel(x_ref, w_ref, b_ref, o_ref):
    # AdaptiveAvgPool2d((1,1)) == mean over spatial, then Linear.
    pooled = jnp.mean(x_ref[...].astype(jnp.float32), axis=1)    # [B, C]
    o_ref[...] = jnp.dot(pooled, w_ref[...],
                         preferred_element_type=jnp.float32) + b_ref[...]


# ------------------------------------------------------------------ pallas_call wrappers

def _compiler_params():
    return pltpu.CompilerParams(
        dimension_semantics=("parallel", "arbitrary"),
        vmem_limit_bytes=VMEM_LIMIT_BYTES)


def _matmul_fused(p, w, gamma=None, beta=None, residual=None, *, bn_relu,
                  out_dtype=jnp.bfloat16):
    """Fused  p[M,K] @ w[K,N]  (+BN +residual +ReLU)  with (N, K)-tiled grid."""
    p = p.astype(jnp.bfloat16)
    w = w.astype(jnp.bfloat16)
    M, K = p.shape
    N = w.shape[1]
    tn = _pick_tile(N, (256, 128))
    tk = _pick_tile(K, (512, 256, 128))
    grid = (N // tn, K // tk)

    in_specs = [pl.BlockSpec((M, tk), lambda n, k: (0, k)),
                pl.BlockSpec((tk, tn), lambda n, k: (k, n))]
    args = [p, w]
    if bn_relu:
        in_specs += [pl.BlockSpec((1, tn), lambda n, k: (0, n)),
                     pl.BlockSpec((1, tn), lambda n, k: (0, n))]
        args += [gamma, beta]
        if residual is not None:
            in_specs.append(pl.BlockSpec((M, tn), lambda n, k: (0, n)))
            args.append(residual.astype(jnp.bfloat16))
            kernel = _mm_bn_add_relu_kernel
        else:
            kernel = _mm_bn_relu_kernel
    else:
        kernel = _mm_plain_kernel

    return pl.pallas_call(
        kernel,
        out_shape=jax.ShapeDtypeStruct((M, N), out_dtype),
        grid=grid,
        in_specs=in_specs,
        out_specs=pl.BlockSpec((M, tn), lambda n, k: (0, n)),
        scratch_shapes=[pltpu.VMEM((M, tn), jnp.float32)],
        compiler_params=_compiler_params(),
    )(*args)


# ------------------------------------------------------------------ conv ops

@functools.partial(jax.jit, static_argnames=("stride", "bn_relu"))
def _conv1x1_jit(x, w, gamma, beta, residual, *, stride, bn_relu):
    if stride > 1:
        # TODO(synk): fold the stride into the BlockSpec index_map instead of a JAX slice.
        x = x[:, ::stride, ::stride, :]
    B, H, W, C = x.shape
    N = w.shape[1]
    r = residual.reshape(B * H * W, N) if residual is not None else None
    out = _matmul_fused(x.reshape(B * H * W, C), w, gamma, beta, r, bn_relu=bn_relu)
    return out.reshape(B, H, W, N)


def conv1x1(x, w, gamma=None, beta=None, *, residual=None, stride=1, bn_relu=True):
    return _conv1x1_jit(x, w, gamma, beta, residual, stride=stride, bn_relu=bn_relu)


@jax.jit
def _conv3x3_direct(x, w3, gamma, beta):
    """Stride-1 3x3 conv + BN + ReLU without materialized im2col."""
    B, H, W, C = x.shape
    Hp, Wp = H + 2, W + 2
    N = w3.shape[2]
    m_wide = B * Hp * Wp
    m_ext = _round_up(m_wide + 2 * Wp + 2, 8)

    xp = jnp.pad(x, ((0, 0), (1, 1), (1, 1), (0, 0))).reshape(m_wide, C)
    xp = jnp.pad(xp, ((0, m_ext - m_wide), (0, 0)))
    mask = jnp.pad(jnp.ones((B, H, W, 1), jnp.float32),
                   ((0, 0), (0, 2), (0, 2), (0, 0))).reshape(m_wide, 1)

    tc = _pick_tile(C, (256, 128))
    tn = _pick_tile(N, (256, 128))
    grid = (N // tn, C // tc)
    kernel = functools.partial(_conv3x3_direct_kernel, wp=Wp, m_wide=m_wide,
                               inv_count=1.0 / float(B * H * W))

    out_wide = pl.pallas_call(
        kernel,
        out_shape=jax.ShapeDtypeStruct((m_wide, N), jnp.bfloat16),
        grid=grid,
        in_specs=[
            pl.BlockSpec((m_ext, tc), lambda n, kc: (0, kc)),
            pl.BlockSpec((9, tc, tn), lambda n, kc: (0, kc, n)),
            pl.BlockSpec((1, tn), lambda n, kc: (0, n)),
            pl.BlockSpec((1, tn), lambda n, kc: (0, n)),
            pl.BlockSpec((m_wide, 1), lambda n, kc: (0, 0)),
        ],
        out_specs=pl.BlockSpec((m_wide, tn), lambda n, kc: (0, n)),
        scratch_shapes=[pltpu.VMEM((m_wide, tn), jnp.float32)],
        compiler_params=_compiler_params(),
    )(xp.astype(jnp.bfloat16), w3, gamma, beta, mask)

    return out_wide.reshape(B, Hp, Wp, N)[:, :H, :W, :]


@functools.partial(jax.jit, static_argnames=("stride",))
def _conv3x3_im2col(x, w3, gamma, beta, *, stride):
    """Fallback path (stem conv with 3 input channels and the 3 stride-2 convs)."""
    B, H, W, C = x.shape
    xp = jnp.pad(x, ((0, 0), (1, 1), (1, 1), (0, 0)))
    Ho = (H + 2 - 3) // stride + 1
    Wo = (W + 2 - 3) // stride + 1
    cols = []
    for dy in range(3):
        for dx in range(3):
            cols.append(xp[:, dy:dy + stride * (Ho - 1) + 1:stride,
                            dx:dx + stride * (Wo - 1) + 1:stride, :])
    patches = jnp.stack(cols, axis=3).reshape(B * Ho * Wo, 9 * C)
    N = w3.shape[2]
    out = _matmul_fused(patches, w3.reshape(9 * C, N), gamma, beta, None, bn_relu=True)
    return out.reshape(B, Ho, Wo, N)


_DIRECT3X3_OK = True


def conv3x3_bn_relu(x, w3, gamma, beta, *, stride):
    global _DIRECT3X3_OK
    if stride == 1 and x.shape[-1] % LANE == 0 and _DIRECT3X3_OK:
        try:
            return _conv3x3_direct(x, w3, gamma, beta)
        except Exception:            # pragma: no cover - safety fallback
            _DIRECT3X3_OK = False
    return _conv3x3_im2col(x, w3, gamma, beta, stride=stride)


@jax.jit
def avgpool_fc(x, w, b):
    B, H, W, C = x.shape
    vmem = pl.BlockSpec(memory_space=pltpu.MemorySpace.VMEM)
    return pl.pallas_call(
        _pool_fc_kernel,
        out_shape=jax.ShapeDtypeStruct((B, w.shape[1]), jnp.float32),
        in_specs=[vmem] * 3, out_specs=vmem,
    )(x.reshape(B, H * W, C), w, b)


# ------------------------------------------------------------------ parameter init (deterministic)

def _conv1x1_weight(key, cin, cout):
    n = 1 * 1 * cout
    w = jax.random.normal(key, (cout, cin), jnp.float32) * math.sqrt(2.0 / n)
    w = w.T                                                    # [cin, cout]
    w = jnp.pad(w, ((0, _cpad(cin) - cin), (0, _cpad(cout) - cout)))
    return w.astype(jnp.bfloat16)


def _conv3x3_weight(key, cin, cout, pad_in=True):
    n = 3 * 3 * cout
    w = jax.random.normal(key, (cout, cin, 3, 3), jnp.float32) * math.sqrt(2.0 / n)
    w = jnp.transpose(w, (2, 3, 1, 0)).reshape(9, cin, cout)   # [tap, cin, cout]
    cin_p = _cpad(cin) if pad_in else cin
    w = jnp.pad(w, ((0, 0), (0, cin_p - cin), (0, _cpad(cout) - cout)))
    return w.astype(jnp.bfloat16)


def _bn_params(c):
    cp = _cpad(c)
    g = jnp.where(jnp.arange(cp) < c, 0.5, 0.0).reshape(1, cp).astype(jnp.float32)
    return g, jnp.zeros((1, cp), jnp.float32)


def _init_block(key, ch, downsample):
    k1, k2, k3, k4 = jax.random.split(key, 4)
    g1, b1 = _bn_params(ch[1])
    g2, b2 = _bn_params(ch[2])
    g3, b3 = _bn_params(ch[3])
    p = {"w1": _conv1x1_weight(k1, ch[0], ch[1]), "g1": g1, "b1": b1,
         "w2": _conv3x3_weight(k2, ch[1], ch[2]), "g2": g2, "b2": b2,
         "w3": _conv1x1_weight(k3, ch[2], ch[3]), "g3": g3, "b3": b3}
    if downsample:
        p["wd"] = _conv1x1_weight(k4, ch[0], ch[3])
    return p


def init_params(key, cfg, num_classes=10):
    k_conv1, k_blocks, k_fc = jax.random.split(key, 3)
    params = {"conv1_w": _conv3x3_weight(k_conv1, 3, cfg[0], pad_in=False)}
    params["bn1_g"], params["bn1_b"] = _bn_params(cfg[0])
    layers = []
    bkey = k_blocks
    for (start, nblocks, _) in LAYER_DEFS:
        blocks = []
        for i in range(nblocks):
            bkey, sub = jax.random.split(bkey)
            ch = cfg[start + 3 * i: start + 3 * i + 4]
            blocks.append(_init_block(sub, ch, downsample=(i == 0)))
        layers.append(blocks)
    params["layers"] = layers
    fc_in = cfg[-1]
    bound = 1.0 / math.sqrt(fc_in)
    kw, kb = jax.random.split(k_fc)
    fc_w = jax.random.uniform(kw, (fc_in, num_classes), jnp.float32, -bound, bound)
    params["fc_w"] = jnp.pad(fc_w, ((0, _cpad(fc_in) - fc_in), (0, 0)))
    params["fc_b"] = jax.random.uniform(kb, (1, num_classes), jnp.float32, -bound, bound)
    return params


# ------------------------------------------------------------------ forward pass

def _block_forward(x, bp, stride, downsample):
    # BaseRestBlockDownsample / ResNetBasicBlock forward
    if downsample:
        residual = conv1x1(x, bp["wd"], stride=stride, bn_relu=False)   # conv only
    else:
        residual = x
    out = conv1x1(x, bp["w1"], bp["g1"], bp["b1"])                       # 1x1 + BN + ReLU
    out = conv3x3_bn_relu(out, bp["w2"], bp["g2"], bp["b2"], stride=stride)
    out = conv1x1(out, bp["w3"], bp["g3"], bp["b3"], residual=residual)  # 1x1 + BN + add + ReLU
    return out


def resnet101_forward(x_nchw, params):
    x = jnp.transpose(x_nchw, (0, 2, 3, 1)).astype(jnp.bfloat16)         # NCHW -> NHWC
    x = conv3x3_bn_relu(x, params["conv1_w"], params["bn1_g"], params["bn1_b"], stride=1)
    for layer, (_, _, stride) in zip(params["layers"], LAYER_DEFS):
        for i, bp in enumerate(layer):
            x = _block_forward(x, bp, stride if i == 0 else 1, downsample=(i == 0))
    return avgpool_fc(x, params["fc_w"], params["fc_b"])


# ------------------------------------------------------------------ main

if __name__ == "__main__":
    # Small test configuration: same ResNet-101 block structure, channels scaled by 1/8,
    # batch=2, 3x16x16 input (CIFAR-like, NCHW — matching the PyTorch module's layout).
    cfg = [c // 8 for c in defaultcfg[101]]
    key = jax.random.PRNGKey(0)
    pkey, xkey = jax.random.split(key)
    params = init_params(pkey, cfg, num_classes=10)   # dataset='data.cifar10' -> 10 classes
    x = jax.random.normal(xkey, (2, 3, 16, 16), jnp.float32)

    out = resnet101_forward(x, params)
    out = jax.block_until_ready(out)
    assert out.shape == (2, 10) and out.dtype == jnp.float32
    print("KERNEL_OK")
</pallas_src>

<mosaic_0001>
module attributes {stable_mosaic.version = 11 : i64} {
  func.func @_mm_bn_relu_kernel(%arg0: i32, %arg1: i32, %arg2: memref<512x27xbf16, #tpu.memory_space<vmem>>, %arg3: memref<27x128xbf16, #tpu.memory_space<vmem>>, %arg4: memref<1x128xf32, #tpu.memory_space<vmem>>, %arg5: memref<1x128xf32, #tpu.memory_space<vmem>>, %arg6: memref<512x128xbf16, #tpu.memory_space<vmem>>, %arg7: memref<512x128xf32, #tpu.memory_space<vmem>>) attributes {dimension_semantics = [#tpu.dimension_semantics<parallel>, #tpu.dimension_semantics<arbitrary>], iteration_bounds = array<i64: 1, 1>, scalar_prefetch = 0 : i64, scratch_operands = 1 : i64, tpu.core_type = #tpu.core_type<tc>, window_params = [{transform_indices = @transform_0, window_bounds = array<i64: 512, 27>}, {transform_indices = @transform_1, window_bounds = array<i64: 27, 128>}, {transform_indices = @transform_2, window_bounds = array<i64: 1, 128>}, {transform_indices = @transform_3, window_bounds = array<i64: 1, 128>}, {transform_indices = @transform_4, window_bounds = array<i64: 512, 128>}]} {
    %c0_i32 = arith.constant 0 : i32
    %0 = arith.cmpi eq, %arg1, %c0_i32 : i32
    %1 = arith.extui %0 : i1 to i32
    %c0_i32_0 = arith.constant 0 : i32
    %2 = arith.cmpi ne, %1, %c0_i32_0 : i32
    scf.if %2 {
      %cst_10 = arith.constant 0.000000e+00 : f32
      %12 = vector.broadcast %cst_10 : f32 to vector<512x128xf32>
      %c0_11 = arith.constant 0 : index
      %c0_12 = arith.constant 0 : index
      %13 = vector.load %arg7[%c0_11, %c0_12] : memref<512x128xf32, #tpu.memory_space<vmem>>, vector<512x128xf32>
      tpu.vector_store %arg7[%c0_11, %c0_12], %12 {strides = array<i32>} : memref<512x128xf32, #tpu.memory_space<vmem>>, vector<512x128xf32>,
    } else {
    }
    %c0 = arith.constant 0 : index
    %c0_1 = arith.constant 0 : index
    %3 = vector.load %arg7[%c0, %c0_1] : memref<512x128xf32, #tpu.memory_space<vmem>>, vector<512x128xf32>
    %c0_2 = arith.constant 0 : index
    %c0_3 = arith.constant 0 : index
    %4 = vector.load %arg2[%c0_2, %c0_3] : memref<512x27xbf16, #tpu.memory_space<vmem>>, vector<512x27xbf16>
    %c0_4 = arith.constant 0 : index
    %c0_5 = arith.constant 0 : index
    %5 = vector.load %arg3[%c0_4, %c0_5] : memref<27x128xbf16, #tpu.memory_space<vmem>>, vector<27x128xbf16>
    %cst = arith.constant dense<0.000000e+00> : vector<512x128xf32>
    %6 = tpu.matmul %4, %5, %cst {dimension_numbers = #tpu.dot_dimension_numbers<[1], [0], [0], [1], [0, 0, 1, 1], [], []>} : vector<512x27xbf16>, vector<27x128xbf16>, vector<512x128xf32> -> vector<512x128xf32>
    %7 = arith.addf %3, %6 : vector<512x128xf32>
    %c0_6 = arith.constant 0 : index
    %c0_7 = arith.constant 0 : index
    %8 = vector.load %arg7[%c0_6, %c0_7] : memref<512x128xf32, #tpu.memory_space<vmem>>, vector<512x128xf32>
    tpu.vector_store %arg7[%c0_6, %c0_7], %7 {strides = array<i32>} : memref<512x128xf32, #tpu.memory_space<vmem>>, vector<512x128xf32>,
    %c0_i32_8 = arith.constant 0 : i32
    %9 = arith.cmpi eq, %arg1, %c0_i32_8 : i32
    %10 = arith.extui %9 : i1 to i32
    %c0_i32_9 = arith.constant 0 : i32
    %11 = arith.cmpi ne, %10, %c0_i32_9 : i32
    scf.if %11 {
      %c0_10 = arith.constant 0 : index
      %c0_11 = arith.constant 0 : index
      %12 = vector.load %arg7[%c0_10, %c0_11] : memref<512x128xf32, #tpu.memory_space<vmem>>, vector<512x128xf32>
      %c0_12 = arith.constant 0 : index
      %c0_13 = arith.constant 0 : index
      %13 = vector.load %arg4[%c0_12, %c0_13] : memref<1x128xf32, #tpu.memory_space<vmem>>, vector<1x128xf32>
      %c0_14 = arith.constant 0 : index
      %c0_15 = arith.constant 0 : index
      %14 = vector.load %arg5[%c0_14, %c0_15] : memref<1x128xf32, #tpu.memory_space<vmem>>, vector<1x128xf32>
      %cst_16 = arith.constant dense<0.000000e+00> : vector<128xf32>
      %15 = vector.multi_reduction <add>, %12, %cst_16 [0] : vector<512x128xf32> to vector<128xf32>
      %16 = vector.shape_cast %15 : vector<128xf32> to vector<1x128xf32>
      %cst_17 = arith.constant 5.120000e+02 : f32
      %17 = vector.broadcast %cst_17 : f32 to vector<1x128xf32>
      %18 = arith.divf %16, %17 : vector<1x128xf32>
      %19 = vector.broadcast %18 : vector<1x128xf32> to vector<512x128xf32>
      %20 = arith.subf %12, %19 : vector<512x128xf32>
      %21 = arith.mulf %20, %20 : vector<512x128xf32>
      %cst_18 = arith.constant dense<0.000000e+00> : vector<128xf32>
      %22 = vector.multi_reduction <add>, %21, %cst_18 [0] : vector<512x128xf32> to vector<128xf32>
      %23 = vector.shape_cast %22 : vector<128xf32> to vector<1x128xf32>
      %cst_19 = arith.constant 5.120000e+02 : f32
      %24 = vector.broadcast %cst_19 : f32 to vector<1x128xf32>
      %25 = arith.divf %23, %24 : vector<1x128xf32>
      %26 = vector.broadcast %18 : vector<1x128xf32> to vector<512x128xf32>
      %27 = arith.subf %12, %26 : vector<512x128xf32>
      %28 = vector.broadcast %13 : vector<1x128xf32> to vector<512x128xf32>
      %29 = arith.mulf %28, %27 : vector<512x128xf32>
      %cst_20 = arith.constant 9.99999974E-6 : f32
      %30 = vector.broadcast %cst_20 : f32 to vector<1x128xf32>
      %31 = arith.addf %25, %30 : vector<1x128xf32>
      %32 = math.rsqrt %31 : vector<1x128xf32>
      %33 = vector.broadcast %32 : vector<1x128xf32> to vector<512x128xf32>
      %34 = arith.mulf %29, %33 : vector<512x128xf32>
      %35 = vector.broadcast %14 : vector<1x128xf32> to vector<512x128xf32>
      %36 = arith.addf %34, %35 : vector<512x128xf32>
      %cst_21 = arith.constant 0.000000e+00 : f32
      %37 = vector.broadcast %cst_21 : f32 to vector<512x128xf32>
      %38 = arith.maximumf %36, %37 : vector<512x128xf32>
      %39 = arith.truncf %38 : vector<512x128xf32> to vector<512x128xbf16>
      %c0_22 = arith.constant 0 : index
      %c0_23 = arith.constant 0 : index
      %40 = vector.load %arg6[%c0_22, %c0_23] : memref<512x128xbf16, #tpu.memory_space<vmem>>, vector<512x128xbf16>
      tpu.vector_store %arg6[%c0_22, %c0_23], %39 {strides = array<i32>} : memref<512x128xbf16, #tpu.memory_space<vmem>>, vector<512x128xbf16>,
    } else {
    }
    return
  }
  func.func @transform_0(%arg0: i32, %arg1: i32) -> (i32, i32) {
    %c0_i32 = arith.constant 0 : i32
    %c0_i32_0 = arith.constant 0 : i32
    return %c0_i32, %arg1 : i32, i32
  }
  func.func @transform_1(%arg0: i32, %arg1: i32) -> (i32, i32) {
    %c0_i32 = arith.constant 0 : i32
    return %arg1, %arg0 : i32, i32
  }
  func.func @transform_2(%arg0: i32, %arg1: i32) -> (i32, i32) {
    %c0_i32 = arith.constant 0 : i32
    %c0_i32_0 = arith.constant 0 : i32
    return %c0_i32, %arg0 : i32, i32
  }
  func.func @transform_3(%arg0: i32, %arg1: i32) -> (i32, i32) {
    %c0_i32 = arith.constant 0 : i32
    %c0_i32_0 = arith.constant 0 : i32
    return %c0_i32, %arg0 : i32, i32
  }
  func.func @transform_4(%arg0: i32, %arg1: i32) -> (i32, i32) {
    %c0_i32 = arith.constant 0 : i32
    %c0_i32_0 = arith.constant 0 : i32
    return %c0_i32, %arg0 : i32, i32
  }
}

</mosaic_0001>

<bundles_post_ra>
// kernel: _conv3x3_im2col.1
= control target key start
LH: loop header
LB: loop body
LE: loop exit
PB: predicated region body
PF: predicated region fallthrough
CT: control target
= control target key end

     0   :  { %vm487_vm0 = vcmask 1044480   ;;  %vm488_vm1 = vcmask 1045504   ;;  %v2410_v1 = vmov 65535   ;;  %vm390_vm2 = vcmask 220160   ;;  %s3873_s0 = inlined_call_operand.vmem [shape: bf16[512,27], index: 0, kind: input, shape index: {}]   ;;  %s3874_s1 = inlined_call_operand.vmem [shape: bf16[27,128], index: 1, kind: input, shape index: {}]   ;;  %s3875_s2 = inlined_call_operand.vmem [shape: f32[1,128], index: 2, kind: input, shape index: {}]   ;;  %s3876_s3 = inlined_call_operand.vmem [shape: f32[1,128], index: 3, kind: input, shape index: {}]   ;;  %s3877_s4 = inlined_call_operand.hbm [shape: bf16[512,128], index: 4, kind: output, shape index: {}]  }
   0x1   :  { %v2352_v0 = vld [vmem:[%s3874_s1 + $0x8] sm:$0x3f]   ;;  %v489_v2 = vsel %vm487_vm0, 4294967295, %v2410_v1  ;;  %v2354_v3 = vld [vmem:[%s3873_s0] sm:$0xff]   ;;  %v2356_v8 = vld [vmem:[%s3873_s0 + $0x10] sm:$0xff]  }
   0x2   :  { %v490_v4 = vsel %vm488_vm1, %v489_v2, 0  ;;  %v2353_v6 = vld [vmem:[%s3874_s1] sm:$0xff]   ;;  %2280 = vmatprep.mubr.msk.bf16.mxu0 %vm390_vm2, %v2354_v3  ;;  %v2355_v7 = vld [vmem:[%s3873_s0 + $0x8] sm:$0xff]   ;;  %v2357_v9 = vld [vmem:[%s3873_s0 + $0x18] sm:$0xff]  }
   0x3   :  { %v492_v5 = vand.u32 %v2352_v0, %v490_v4  ;;  %v2358_v10 = vld [vmem:[%s3873_s0 + $0x20] sm:$0xff]   ;;  %v2371_v12 = vld [vmem:[%s3873_s0 + $0x88] sm:$0xff]   ;;  %v2372_v13 = vld [vmem:[%s3873_s0 + $0x90] sm:$0xff]  }
   0x4   :  { %v2370_v11 = vld [vmem:[%s3873_s0 + $0x80] sm:$0xff]   ;;  %v2359_v14 = vld [vmem:[%s3873_s0 + $0x28] sm:$0xff]   ;;  %v2360_v15 = vld [vmem:[%s3873_s0 + $0x30] sm:$0xff]  }
   0x5   :  { %2276 = vmatprep.subr.bf16.mxu0 %v492_v5  ;;  %2344 = vmatprep.subr.bf16.mxu1 %v492_v5  ;;  %v2373_v16 = vld [vmem:[%s3873_s0 + $0x98] sm:$0xff]   ;;  %v2374_v17 = vld [vmem:[%s3873_s0 + $0xa0] sm:$0xff]   ;;  %v2375_v19 = vld [vmem:[%s3873_s0 + $0xa8] sm:$0xff]  }
   0x6   :  { %2277 = vmatpush3.bf16.msra.mxu0 %v492_v5  ;;  %2346 = vmatpush3.bf16.msra.mxu1 %v492_v5  ;;  %v2361_v18 = vld [vmem:[%s3873_s0 + $0x38] sm:$0xff]  }
   0x7   :  { %2278 = vmatprep.subr.bf16.mxu0 %v2353_v6  ;;  %2345 = vmatprep.subr.bf16.mxu1 %v2353_v6 }
   0x8   :  { %2312 = vmatprep.mubr.msk.bf16.mxu1 %vm390_vm2, %v2370_v11 }
   0xa   :  { %2279 = vmatpush3.bf16.msra.mxu0 %v2353_v6  ;;  %2347 = vmatpush3.bf16.msra.mxu1 %v2353_v6 }
   0xd   :  { %2281 = vmatmul.mubr.msk.bf16.vlgmr.msra.gmra.mxu0 %vm390_vm2, %v2355_v7  ;;  %2313 = vmatmul.mubr.msk.bf16.vlgmr.msra.gmra.mxu1 %vm390_vm2, %v2371_v12 }
   0xe   :  { %2284 = vmatprep.mubr.msk.bf16.mxu0 %vm390_vm2, %v2356_v8  ;;  %2316 = vmatprep.mubr.msk.bf16.mxu1 %vm390_vm2, %v2372_v13 }
  0x15   :  { %2285 = vmatmul.mubr.msk.bf16.gmra.mxu0 %vm390_vm2, %v2357_v9  ;;  %2317 = vmatmul.mubr.msk.bf16.gmra.mxu1 %vm390_vm2, %v2373_v16 }
  0x16   :  { %2288 = vmatprep.mubr.msk.bf16.mxu0 %vm390_vm2, %v2358_v10  ;;  %2320 = vmatprep.mubr.msk.bf16.mxu1 %vm390_vm2, %v2374_v17 }
  0x1d   :  { %2289 = vmatmul.mubr.msk.bf16.gmra.mxu0 %vm390_vm2, %v2359_v14 }
  0x1e   :  { %2292 = vmatprep.mubr.msk.bf16.mxu0 %vm390_vm2, %v2360_v15 }
  0x1f   :  { %9 = vsyncpa [#allocation4], 0  ;;  %v2362_v20 = vld [vmem:[%s3873_s0 + $0x40] sm:$0xff]   ;;  %v2376_v21 = vld [vmem:[%s3873_s0 + $0xb0] sm:$0xff]   ;;  %2321 = vmatmul.mubr.msk.bf16.gmra.mxu1 %vm390_vm2, %v2375_v19 }
  0x20   :  { %2324 = vmatprep.mubr.msk.bf16.mxu1 %vm390_vm2, %v2376_v21  ;;  %v2363_v22 = vld [vmem:[%s3873_s0 + $0x48] sm:$0xff]   ;;  %v2377_v23 = vld [vmem:[%s3873_s0 + $0xb8] sm:$0xff]   ;;  %v2364_v24 = vld [vmem:[%s3873_s0 + $0x50] sm:$0xff]  }
  0x21   :  { %v2378_v25 = vld [vmem:[%s3873_s0 + $0xc0] sm:$0xff]   ;;  %v2365_v26 = vld [vmem:[%s3873_s0 + $0x58] sm:$0xff]   ;;  %v2379_v27 = vld [vmem:[%s3873_s0 + $0xc8] sm:$0xff]  }
  0x22   :  { %v2366_v28 = vld [vmem:[%s3873_s0 + $0x60] sm:$0xff]   ;;  %v2380_v29 = vld [vmem:[%s3873_s0 + $0xd0] sm:$0xff]   ;;  %v2367_v30 = vld [vmem:[%s3873_s0 + $0x68] sm:$0xff]  }
  0x23   :  { %v2381_v31 = vld [vmem:[%s3873_s0 + $0xd8] sm:$0xff]   ;;  %v2368_v32 = vld [vmem:[%s3873_s0 + $0x70] sm:$0xff]   ;;  %v2382_v33 = vld [vmem:[%s3873_s0 + $0xe0] sm:$0xff]  }
  0x24   :  { %v2369_v34 = vld [vmem:[%s3873_s0 + $0x78] sm:$0xff]   ;;  %v2383_v35 = vld [vmem:[%s3873_s0 + $0xe8] sm:$0xff]   ;;  %v2384_v36 = vld [vmem:[%s3873_s0 + $0xf0] sm:$0xff]  }
  0x25   :  { %2293 = vmatmul.mubr.msk.bf16.gmra.mxu0 %vm390_vm2, %v2361_v18  ;;  %v2385_v37 = vld [vmem:[%s3873_s0 + $0xf8] sm:$0xff]  }
  0x26   :  { %2296 = vmatprep.mubr.msk.bf16.mxu0 %vm390_vm2, %v2362_v20 }
  0x27   :  { %2325 = vmatmul.mubr.msk.bf16.gmra.mxu1 %vm390_vm2, %v2377_v23 }
  0x28   :  { %2328 = vmatprep.mubr.msk.bf16.mxu1 %vm390_vm2, %v2378_v25 }
  0x2d   :  { %2297 = vmatmul.mubr.msk.bf16.gmra.mxu0 %vm390_vm2, %v2363_v22 }
  0x2e   :  { %2300 = vmatprep.mubr.msk.bf16.mxu0 %vm390_vm2, %v2364_v24 }
  0x2f   :  { %2329 = vmatmul.mubr.msk.bf16.gmra.mxu1 %vm390_vm2, %v2379_v27 }
  0x30   :  { %2332 = vmatprep.mubr.msk.bf16.mxu1 %vm390_vm2, %v2380_v29 }
  0x35   :  { %2301 = vmatmul.mubr.msk.bf16.gmra.mxu0 %vm390_vm2, %v2365_v26 }
  0x36   :  { %2304 = vmatprep.mubr.msk.bf16.mxu0 %vm390_vm2, %v2366_v28 }
  0x37   :  { %2333 = vmatmul.mubr.msk.bf16.gmra.mxu1 %vm390_vm2, %v2381_v31 }
  0x38   :  { %2336 = vmatprep.mubr.msk.bf16.mxu1 %vm390_vm2, %v2382_v33 }
  0x3d   :  { %2305 = vmatmul.mubr.msk.bf16.gmra.mxu0 %vm390_vm2, %v2367_v30 }
  0x3e   :  { %2308 = vmatprep.mubr.msk.bf16.mxu0 %vm390_vm2, %v2368_v32 }
  0x3f   :  { %2337 = vmatmul.mubr.msk.bf16.gmra.mxu1 %vm390_vm2, %v2383_v35 }
  0x40   :  { %2340 = vmatprep.mubr.msk.bf16.mxu1 %vm390_vm2, %v2384_v36 }
  0x45   :  { %2309 = vmatmul.mubr.msk.bf16.gmra.mxu0 %vm390_vm2, %v2369_v34 }
  0x47   :  { %2341 = vmatmul.mubr.msk.bf16.gmra.mxu1 %vm390_vm2, %v2385_v37 }
  0xcd   :  { %v2573_v38 = vpop.f32.mrf.mxu0  ;;  %v2585_v44 = vpop.f32.mrf.mxu1 }
  0xcf   :  { %v2575_v39 = vpop.f32.mrf.mxu0  ;;  %v2590_v47 = vpop.f32.mrf.mxu1 }
  0xd1   :  { %v2577_v40 = vpop.f32.mrf.mxu0  ;;  %v2595_v50 = vpop.f32.mrf.mxu1 }
  0xd3   :  { %v2579_v41 = vpop.f32.mrf.mxu0  ;;  %v2600_v53 = vpop.f32.mrf.mxu1 }
  0xd4   :  { %v980_v42 = vadd.f32 %v2579_v41, %v2575_v39 }
  0xd5   :  { %v2583_v43 = vpop.f32.mrf.mxu0  ;;  %v2608_v58 = vpop.f32.mrf.mxu1 }
  0xd6   :  { %v981_v45 = vadd.f32 %v2573_v38, %v980_v42 }
  0xd7   :  { %v2588_v46 = vpop.f32.mrf.mxu0  ;;  %v2616_v63 = vpop.f32.mrf.mxu1 }
  0xd8   :  { %v982_v48 = vadd.f32 %v2577_v40, %v981_v45 }
  0xd9   :  { %v2593_v49 = vpop.f32.mrf.mxu0  ;;  %v2624_v4 = vpop.f32.mrf.mxu1 }
  0xda   :  { %v983_v51 = vadd.f32 %v982_v48, %v2588_v46  ;;  %3908 = vst [vmem:[#allocation6_spill] sm:$0xff] %v2624_v4 }
  0xdb   :  { %v2598_v52 = vpop.f32.mrf.mxu0  ;;  %v2632_v9 = vpop.f32.mrf.mxu1 }
  0xdc   :  { %v984_v54 = vadd.f32 %v983_v51, %v2598_v52 }
  0xdd   :  { %v2603_v55 = vpop.f32.mrf.mxu0 }
  0xde   :  { %v985_v56 = vadd.f32 %v2583_v43, %v984_v54 }
  0xdf   :  { %v2606_v57 = vpop.f32.mrf.mxu0  ;;  %v2640_v14 = vpop.f32.mrf.mxu1 }
  0xe0   :  { %v986_v59 = vadd.f32 %v2593_v49, %v985_v56 }
  0xe1   :  { %v2611_v60 = vpop.f32.mrf.mxu0  ;;  %v2648_v19 = vpop.f32.mrf.mxu1 }
  0xe2   :  { %v987_v61 = vadd.f32 %v986_v59, %v2606_v57 }
  0xe3   :  { %v2614_v62 = vpop.f32.mrf.mxu0  ;;  %v2656_v24 = vpop.f32.mrf.mxu1 }
  0xe4   :  { %v988_v0 = vadd.f32 %v987_v61, %v2614_v62  ;;  %3909 = vst [vmem:[#allocation7_spill] sm:$0xff] %v2656_v24 }
  0xe5   :  { %v2619_v1 = vpop.f32.mrf.mxu0  ;;  %v2664_v29 = vpop.f32.mrf.mxu1 }
  0xe6   :  { %v989_v2 = vadd.f32 %v2603_v55, %v988_v0  ;;  %3910 = vst [vmem:[#allocation8_spill] sm:$0xff] %v2664_v29 }
  0xe7   :  { %v2622_v3 = vpop.f32.mrf.mxu0  ;;  %v2672_v34 = vpop.f32.mrf.mxu1 }
  0xe8   :  { %v990_v5 = vadd.f32 %v2611_v60, %v989_v2 }
  0xe9   :  { %v2627_v6 = vpop.f32.mrf.mxu0  ;;  %v2680_v45 = vpop.f32.mrf.mxu1 }
  0xea   :  { %v991_v7 = vadd.f32 %v990_v5, %v2622_v3 }
  0xeb   :  { %v2630_v8 = vpop.f32.mrf.mxu0  ;;  %v2688_v59 = vpop.f32.mrf.mxu1 }
  0xec   :  { %v992_v10 = vadd.f32 %v991_v7, %v2630_v8  ;;  %3911 = vst [vmem:[#allocation9_spill] sm:$0xff] %v2688_v59 }
  0xed   :  { %v2635_v11 = vpop.f32.mrf.mxu0  ;;  %v2696_v7 = vpop.f32.mrf.mxu1 }
  0xee   :  { %v993_v12 = vadd.f32 %v2619_v1, %v992_v10  ;;  %3912 = vst [vmem:[#allocation10_spill] sm:$0xff] %v2696_v7 }
  0xef   :  { %v2638_v13 = vpop.f32.mrf.mxu0 }
  0xf0   :  { %v994_v15 = vadd.f32 %v2627_v6, %v993_v12 }
  0xf1   :  { %v2643_v16 = vpop.f32.mrf.mxu0 }
  0xf2   :  { %v995_v17 = vadd.f32 %v994_v15, %v2638_v13  ;;  %v2700_v15 = vpop.f32.mrf.mxu1 }
  0xf3   :  { %v2646_v18 = vpop.f32.mrf.mxu0  ;;  %3913 = vst [vmem:[#allocation11_spill] sm:$0xff] %v2700_v15 }
  0xf4   :  { %v996_v20 = vadd.f32 %v995_v17, %v2646_v18 }
  0xf5   :  { %v2651_v21 = vpop.f32.mrf.mxu0 }
  0xf6   :  { %v997_v22 = vadd.f32 %v2635_v11, %v996_v20 }
  0xf7   :  { %v2654_v23 = vpop.f32.mrf.mxu0 }
  0xf8   :  { %v998_v25 = vadd.f32 %v2643_v16, %v997_v22  ;;  %v2704_v22 = vpop.f32.mrf.mxu1 }
  0xf9   :  { %v2659_v26 = vpop.f32.mrf.mxu0 }
  0xfa   :  { %v999_v27 = vadd.f32 %v998_v25, %v2654_v23 }
  0xfb   :  { %v2662_v28 = vpop.f32.mrf.mxu0 }
  0xfc   :  { %v1000_v30 = vadd.f32 %v999_v27, %v2662_v28 }
  0xfd   :  { %v2667_v31 = vpop.f32.mrf.mxu0 }
  0xfe   :  { %v1001_v32 = vadd.f32 %v2651_v21, %v1000_v30  ;;  %v2708_v30 = vpop.f32.mrf.mxu1 }
  0xff   :  { %v2670_v33 = vpop.f32.mrf.mxu0  ;;  %3914 = vst [vmem:[#allocation12_spill] sm:$0xff] %v2708_v30 }
 0x100   :  { %v1002_v35 = vadd.f32 %v2659_v26, %v1001_v32 }
 0x101   :  { %v2675_v36 = vpop.f32.mrf.mxu0 }
 0x102   :  { %v1003_v37 = vadd.f32 %v1002_v35, %v2670_v33 }
 0x103   :  { %v2678_v42 = vpop.f32.mrf.mxu0 }
 0x104   :  { %v1004_v48 = vadd.f32 %v1003_v37, %v2678_v42  ;;  %v2712_v37 = vpop.f32.mrf.mxu1 }
 0x105   :  { %v2683_v51 = vpop.f32.mrf.mxu0  ;;  %3915 = vst [vmem:[#allocation13_spill] sm:$0xff] %v2712_v37 }
 0x106   :  { %v1005_v54 = vadd.f32 %v2667_v31, %v1004_v48 }
 0x107   :  { %v2686_v56 = vpop.f32.mrf.mxu0 }
 0x108   :  { %v1006_v61 = vadd.f32 %v2675_v36, %v1005_v54 }
 0x109   :  { %v2691_v0 = vpop.f32.mrf.mxu0 }
 0x10a   :  { %v1007_v2 = vadd.f32 %v1006_v61, %v2686_v56  ;;  %v2716_v61 = vpop.f32.mrf.mxu1 }
 0x10b   :  { %v2694_v5 = vpop.f32.mrf.mxu0  ;;  %3916 = vst [vmem:[#allocation14_spill] sm:$0xff] %v2716_v61 }
 0x10c   :  { %v1008_v10 = vadd.f32 %v1007_v2, %v2694_v5 }
 0x10e   :  { %v1009_v12 = vadd.f32 %v2683_v51, %v1008_v10 }
 0x110   :  { %v1010_v17 = vadd.f32 %v2691_v0, %v1009_v12  ;;  %v2720_v12 = vpop.f32.mrf.mxu1 }
 0x111   :  { %3917 = vst [vmem:[#allocation15_spill] sm:$0xff] %v2720_v12 }
 0x112   :  { %v1011_v20 = vadd.f32 %v1010_v17, %v2590_v47 }
 0x114   :  { %v1012_v25 = vadd.f32 %v1011_v20, %v2600_v53 }
 0x116   :  { %v1013_v27 = vadd.f32 %v2585_v44, %v1012_v25  ;;  %v2724_v25 = vpop.f32.mrf.mxu1 }
 0x117   :  { %3918 = vst [vmem:[#allocation16_spill] sm:$0xff] %v2724_v25 }
 0x118   :  { %v1014_v32 = vadd.f32 %v2595_v50, %v1013_v27 }
 0x11a   :  { %v1015_v35 = vadd.f32 %v1014_v32, %v2616_v63 }
 0x11c   :  { %v1016_v48 = vadd.f32 %v1015_v35, %v2632_v9  ;;  %v2728_v35 = vpop.f32.mrf.mxu1 }
 0x11d   :  { %3919 = vst [vmem:[#allocation17_spill] sm:$0xff] %v2728_v35 }
 0x11e   :  { %v1017_v54 = vadd.f32 %v2608_v58, %v1016_v48 }
 0x120   :  { %v1018_v2 = vadd.f32 %v2624_v4, %v1017_v54  ;;  %v2732_v4 = vpop.f32.mrf.mxu1 }
 0x122   :  { %v1019_v10 = vadd.f32 %v1018_v2, %v2648_v19 }
 0x124   :  { %v1020_v17 = vadd.f32 %v1019_v10, %v2664_v29  ;;  %v2736_v29 = vpop.f32.mrf.mxu1 }
 0x125   :  { %3920 = vst [vmem:[#allocation18_spill] sm:$0xff] %v2736_v29 }
 0x126   :  { %v1021_v20 = vadd.f32 %v2640_v14, %v1020_v17 }
 0x128   :  { %v1022_v27 = vadd.f32 %v2656_v24, %v1021_v20  ;;  %v2740_v24 = vpop.f32.mrf.mxu1 }
 0x12a   :  { %v1023_v32 = vadd.f32 %v1022_v27, %v2680_v45 }
 0x12c   :  { %v1024_v48 = vadd.f32 %v1023_v32, %v2696_v7  ;;  %v2744_v7 = vpop.f32.mrf.mxu1 }
 0x12d   :  { %3921 = vst [vmem:[#allocation19_spill] sm:$0xff] %v2744_v7 }
 0x12e   :  { %v1025_v54 = vadd.f32 %v2672_v34, %v1024_v48 }
 0x130   :  { %v1026_v2 = vadd.f32 %v2688_v59, %v1025_v54  ;;  %v2748_v59 = vpop.f32.mrf.mxu1 }
 0x132   :  { %v1027_v10 = vadd.f32 %v1026_v2, %v2704_v22 }
 0x134   :  { %v1028_v17 = vadd.f32 %v1027_v10, %v2712_v37  ;;  %v2752_v37 = vpop.f32.mrf.mxu1 }
 0x136   :  { %v1029_v20 = vadd.f32 %v2700_v15, %v1028_v17 }
 0x138   :  { %v1030_v27 = vadd.f32 %v2708_v30, %v1029_v20  ;;  %v2756_v30 = vpop.f32.mrf.mxu1 }
 0x13a   :  { %v1031_v32 = vadd.f32 %v1030_v27, %v2720_v12 }
 0x13c   :  { %v1032_v48 = vadd.f32 %v1031_v32, %v2728_v35  ;;  %v771_v35 = vpop.f32.mrf.mxu1 }
 0x13e   :  { %v1033_v54 = vadd.f32 %v2716_v61, %v1032_v48 }
 0x140   :  { %v1034_v2 = vadd.f32 %v2724_v25, %v1033_v54 }
 0x142   :  { %v1035_v10 = vadd.f32 %v1034_v2, %v2736_v29 }
 0x144   :  { %v1036_v17 = vadd.f32 %v1035_v10, %v2744_v7 }
 0x146   :  { %v1037_v20 = vadd.f32 %v2732_v4, %v1036_v17 }
 0x148   :  { %v1038_v27 = vadd.f32 %v2740_v24, %v1037_v20 }
 0x14a   :  { %v1039_v32 = vadd.f32 %v1038_v27, %v2752_v37 }
 0x14c   :  { %v1040_v48 = vadd.f32 %v1039_v32, %v771_v35 }
 0x14e   :  { %v1041_v61 = vadd.f32 %v2748_v59, %v1040_v48 }
 0x150   :  { %v1042_v54 = vadd.f32 %v2756_v30, %v1041_v61 }
 0x152   :  { %v1043_v25 = vrot.slane %v1042_v54, 4 }
 0x154   :  { %v1044_v2 = vadd.f32 %v1043_v25, %v1042_v54 }
 0x156   :  { %v1045_v29 = vrot.slane %v1044_v2, 2 }
 0x158   :  { %v1046_v12 = vadd.f32 %v1045_v29, %v1044_v2 }
 0x15a   :  { %v1047_v15 = vrot.slane %v1046_v12, 1 }
 0x15c   :  { %v1048_v10 = vadd.f32 %v1047_v15, %v1046_v12 }
 0x15e   :  { %v2762_v7 = vmul.f32 0.001953125, %v1048_v10 }
 0x160   :  { %v2765_v17 = vsub.f32 %v771_v35, %v2762_v7  ;;  %v2769_v20 = vsub.f32 %v2575_v39, %v2762_v7  ;;  %v2773_v27 = vsub.f32 %v2579_v41, %v2762_v7  ;;  %v2777_v61 = vsub.f32 %v2573_v38, %v2762_v7 }
 0x161   :  { %v2785_v12 = vsub.f32 %v2577_v40, %v2762_v7  ;;  %v2789_v39 = vsub.f32 %v2588_v46, %v2762_v7  ;;  %v2795_v38 = vsub.f32 %v2598_v52, %v2762_v7  ;;  %v2801_v40 = vsub.f32 %v2583_v43, %v2762_v7 }
 0x162   :  { %v1115_v29 = vmul.f32 %v2769_v20, %v2769_v20  ;;  %v1116_v15 = vmul.f32 %v2773_v27, %v2773_v27  ;;  %v1117_v41 = vmul.f32 %v2777_v61, %v2777_v61  ;;  %v2807_v54 = vsub.f32 %v2593_v49, %v2762_v7 }
 0x163   :  { %v1118_v35 = vmul.f32 %v2785_v12, %v2785_v12  ;;  %v1119_v46 = vmul.f32 %v2789_v39, %v2789_v39  ;;  %v1120_v52 = vmul.f32 %v2795_v38, %v2795_v38  ;;  %v2813_v10 = vsub.f32 %v2606_v57, %v2762_v7 }
 0x164   :  { %v1179_v25 = vadd.f32 %v1116_v15, %v1115_v29  ;;  %v1121_v43 = vmul.f32 %v2801_v40, %v2801_v40  ;;  %v2819_v15 = vsub.f32 %v2614_v62, %v2762_v7  ;;  %v1122_v49 = vmul.f32 %v2807_v54, %v2807_v54 }
 0x165   :  { %v1123_v57 = vmul.f32 %v2813_v10, %v2813_v10 }
 0x166   :  { %v1180_v32 = vadd.f32 %v1179_v25, %v1117_v41  ;;  %v2825_v25 = vsub.f32 %v2603_v55, %v2762_v7  ;;  %v1124_v62 = vmul.f32 %v2819_v15, %v2819_v15 }
 0x168   :  { %v1181_v48 = vadd.f32 %v1180_v32, %v1118_v35  ;;  %v2831_v32 = vsub.f32 %v2611_v60, %v2762_v7  ;;  %v1125_v55 = vmul.f32 %v2825_v25, %v2825_v25 }
 0x16a   :  { %v1182_v2 = vadd.f32 %v1181_v48, %v1119_v46  ;;  %v2837_v48 = vsub.f32 %v2622_v3, %v2762_v7  ;;  %v1126_v60 = vmul.f32 %v2831_v32, %v2831_v32 }
 0x16c   :  { %v1183_v29 = vadd.f32 %v1182_v2, %v1120_v52  ;;  %v2843_v2 = vsub.f32 %v2630_v8, %v2762_v7  ;;  %v1127_v3 = vmul.f32 %v2837_v48, %v2837_v48 }
 0x16e   :  { %v1184_v41 = vadd.f32 %v1183_v29, %v1121_v43  ;;  %v2849_v29 = vsub.f32 %v2619_v1, %v2762_v7  ;;  %v1128_v8 = vmul.f32 %v2843_v2, %v2843_v2 }
 0x170   :  { %v1185_v35 = vadd.f32 %v1184_v41, %v1122_v49  ;;  %v2855_v41 = vsub.f32 %v2627_v6, %v2762_v7  ;;  %v1129_v1 = vmul.f32 %v2849_v29, %v2849_v29 }
 0x172   :  { %v1186_v46 = vadd.f32 %v1185_v35, %v1123_v57  ;;  %v2861_v35 = vsub.f32 %v2638_v13, %v2762_v7  ;;  %v1130_v6 = vmul.f32 %v2855_v41, %v2855_v41 }
 0x174   :  { %v1187_v52 = vadd.f32 %v1186_v46, %v1124_v62  ;;  %v2867_v46 = vsub.f32 %v2646_v18, %v2762_v7  ;;  %v1131_v13 = vmul.f32 %v2861_v35, %v2861_v35 }
 0x176   :  { %v1188_v43 = vadd.f32 %v1187_v52, %v1125_v55  ;;  %v2873_v52 = vsub.f32 %v2635_v11, %v2762_v7  ;;  %v1132_v18 = vmul.f32 %v2867_v46, %v2867_v46 }
 0x178   :  { %v1189_v49 = vadd.f32 %v1188_v43, %v1126_v60  ;;  %v2879_v43 = vsub.f32 %v2643_v16, %v2762_v7  ;;  %v1133_v11 = vmul.f32 %v2873_v52, %v2873_v52 }
 0x17a   :  { %v1190_v57 = vadd.f32 %v1189_v49, %v1127_v3  ;;  %v2885_v49 = vsub.f32 %v2654_v23, %v2762_v7  ;;  %v1134_v16 = vmul.f32 %v2879_v43, %v2879_v43 }
 0x17c   :  { %v1191_v62 = vadd.f32 %v1190_v57, %v1128_v8  ;;  %v2891_v57 = vsub.f32 %v2662_v28, %v2762_v7  ;;  %v1135_v23 = vmul.f32 %v2885_v49, %v2885_v49 }
 0x17e   :  { %v1192_v55 = vadd.f32 %v1191_v62, %v1129_v1  ;;  %v2897_v62 = vsub.f32 %v2651_v21, %v2762_v7  ;;  %v1136_v28 = vmul.f32 %v2891_v57, %v2891_v57 }
 0x180   :  { %v1193_v60 = vadd.f32 %v1192_v55, %v1130_v6  ;;  %v2903_v55 = vsub.f32 %v2659_v26, %v2762_v7  ;;  %v1137_v21 = vmul.f32 %v2897_v62, %v2897_v62 }
 0x182   :  { %v1194_v3 = vadd.f32 %v1193_v60, %v1131_v13  ;;  %v2909_v60 = vsub.f32 %v2670_v33, %v2762_v7  ;;  %v1138_v26 = vmul.f32 %v2903_v55, %v2903_v55 }
 0x184   :  { %v1195_v8 = vadd.f32 %v1194_v3, %v1132_v18  ;;  %v2915_v3 = vsub.f32 %v2678_v42, %v2762_v7  ;;  %v1139_v33 = vmul.f32 %v2909_v60, %v2909_v60 }
 0x186   :  { %v1196_v1 = vadd.f32 %v1195_v8, %v1133_v11  ;;  %v2921_v8 = vsub.f32 %v2667_v31, %v2762_v7  ;;  %v1140_v42 = vmul.f32 %v2915_v3, %v2915_v3 }
 0x188   :  { %v1197_v6 = vadd.f32 %v1196_v1, %v1134_v16  ;;  %v2927_v1 = vsub.f32 %v2675_v36, %v2762_v7  ;;  %v1141_v31 = vmul.f32 %v2921_v8, %v2921_v8 }
 0x18a   :  { %v1198_v13 = vadd.f32 %v1197_v6, %v1135_v23  ;;  %v2933_v6 = vsub.f32 %v2686_v56, %v2762_v7  ;;  %v1142_v36 = vmul.f32 %v2927_v1, %v2927_v1 }
 0x18c   :  { %v1199_v18 = vadd.f32 %v1198_v13, %v1136_v28  ;;  %v2939_v13 = vsub.f32 %v2694_v5, %v2762_v7  ;;  %v1143_v56 = vmul.f32 %v2933_v6, %v2933_v6 }
 0x18e   :  { %v1200_v11 = vadd.f32 %v1199_v18, %v1137_v21  ;;  %v2945_v18 = vsub.f32 %v2683_v51, %v2762_v7  ;;  %v1144_v5 = vmul.f32 %v2939_v13, %v2939_v13 }
 0x190   :  { %v1201_v16 = vadd.f32 %v1200_v11, %v1138_v26  ;;  %v2951_v11 = vsub.f32 %v2691_v0, %v2762_v7  ;;  %v1145_v51 = vmul.f32 %v2945_v18, %v2945_v18 }
 0x192   :  { %v1202_v23 = vadd.f32 %v1201_v16, %v1139_v33  ;;  %v2957_v16 = vsub.f32 %v2590_v47, %v2762_v7  ;;  %v1146_v0 = vmul.f32 %v2951_v11, %v2951_v11 }
 0x194   :  { %v1203_v28 = vadd.f32 %v1202_v23, %v1140_v42  ;;  %v2963_v23 = vsub.f32 %v2600_v53, %v2762_v7  ;;  %v1147_v47 = vmul.f32 %v2957_v16, %v2957_v16 }
 0x196   :  { %v1204_v21 = vadd.f32 %v1203_v28, %v1141_v31  ;;  %v2969_v28 = vsub.f32 %v2585_v44, %v2762_v7  ;;  %v1148_v53 = vmul.f32 %v2963_v23, %v2963_v23 }
 0x198   :  { %v1205_v26 = vadd.f32 %v1204_v21, %v1142_v36  ;;  %v2975_v21 = vsub.f32 %v2595_v50, %v2762_v7  ;;  %v1149_v44 = vmul.f32 %v2969_v28, %v2969_v28 }
 0x19a   :  { %v1206_v33 = vadd.f32 %v1205_v26, %v1143_v56  ;;  %v2981_v26 = vsub.f32 %v2616_v63, %v2762_v7  ;;  %v1150_v50 = vmul.f32 %v2975_v21, %v2975_v21 }
 0x19c   :  { %v1207_v42 = vadd.f32 %v1206_v33, %v1144_v5  ;;  %v2987_v33 = vsub.f32 %v2632_v9, %v2762_v7  ;;  %v1151_v63 = vmul.f32 %v2981_v26, %v2981_v26 }
 0x19e   :  { %v1208_v31 = vadd.f32 %v1207_v42, %v1145_v51  ;;  %v2993_v42 = vsub.f32 %v2608_v58, %v2762_v7  ;;  %v1152_v9 = vmul.f32 %v2987_v33, %v2987_v33 }
 0x1a0   :  { %v1209_v36 = vadd.f32 %v1208_v31, %v1146_v0  ;;  %3922 = vst [vmem:[#allocation20_spill] sm:$0xff] %v2993_v42  ;;  %v3923_v31 = vld [vmem:[#allocation6_spill] sm:$0xff]  ;;  %v1153_v58 = vmul.f32 %v2993_v42, %v2993_v42 }
 0x1a2   :  { %v1210_v56 = vadd.f32 %v1209_v36, %v1147_v47  ;;  %v2999_v47 = vsub.f32 %v3923_v31, %v2762_v7  ;;  %v3017_v31 = vsub.f32 %v2640_v14, %v2762_v7 }
 0x1a4   :  { %v1211_v5 = vadd.f32 %v1210_v56, %v1148_v53  ;;  %v3005_v53 = vsub.f32 %v2648_v19, %v2762_v7  ;;  %v1157_v14 = vmul.f32 %v3017_v31, %v3017_v31 }
 0x1a6   :  { %v1212_v51 = vadd.f32 %v1211_v5, %v1149_v44  ;;  %3924 = vst [vmem:[#allocation6_spill] sm:$0xff] %v3005_v53  ;;  %v3925_v44 = vld [vmem:[#allocation8_spill] sm:$0xff]  ;;  %v1155_v19 = vmul.f32 %v3005_v53, %v3005_v53 }
 0x1a7   :  { %v3011_v5 = vsub.f32 %v3925_v44, %v2762_v7  ;;  %3926 = vst [vmem:[#allocation8_spill] sm:$0xff] %v3017_v31  ;;  %v3029_v44 = vsub.f32 %v2680_v45, %v2762_v7 }
 0x1a8   :  { %v1213_v0 = vadd.f32 %v1212_v51, %v1150_v50  ;;  %v1154_v50 = vmul.f32 %v2999_v47, %v2999_v47 }
 0x1a9   :  { %v1159_v45 = vmul.f32 %v3029_v44, %v3029_v44 }
 0x1aa   :  { %v1214_v36 = vadd.f32 %v1213_v0, %v1151_v63  ;;  %v3927_v0 = vld [vmem:[#allocation7_spill] sm:$0xff] }
 0x1ab   :  { %v3023_v42 = vsub.f32 %v3927_v0, %v2762_v7  ;;  %3928 = vst [vmem:[#allocation7_spill] sm:$0xff] %v3029_v44  ;;  %v3041_v0 = vsub.f32 %v2672_v34, %v2762_v7 }
 0x1ac   :  { %v1215_v56 = vadd.f32 %v1214_v36, %v1152_v9  ;;  %v1156_v9 = vmul.f32 %v3011_v5, %v3011_v5 }
 0x1ad   :  { %3931 = vst [vmem:[#allocation21_spill] sm:$0xff] %v3041_v0  ;;  %v1161_v34 = vmul.f32 %v3041_v0, %v3041_v0 }
 0x1ae   :  { %v1216_v51 = vadd.f32 %v1215_v56, %v1153_v58  ;;  %v3929_v56 = vld [vmem:[#allocation10_spill] sm:$0xff] }
 0x1af   :  { %v3035_v53 = vsub.f32 %v3929_v56, %v2762_v7  ;;  %v3053_v56 = vsub.f32 %v2704_v22, %v2762_v7 }
 0x1b0   :  { %v1217_v63 = vadd.f32 %v1216_v51, %v1154_v50  ;;  %v1158_v50 = vmul.f32 %v3023_v42, %v3023_v42 }
 0x1b1   :  { %3930 = vst [vmem:[#allocation10_spill] sm:$0xff] %v3035_v53  ;;  %3934 = vst [vmem:[#allocation22_spill] sm:$0xff] %v3053_v56  ;;  %v1163_v22 = vmul.f32 %v3053_v56, %v3053_v56 }
 0x1b2   :  { %v1218_v36 = vadd.f32 %v1217_v63, %v1155_v19  ;;  %v3932_v63 = vld [vmem:[#allocation9_spill] sm:$0xff] }
 0x1b3   :  { %v3047_v31 = vsub.f32 %v3932_v63, %v2762_v7  ;;  %v3937_v63 = vld [vmem:[#allocation11_spill] sm:$0xff] }
 0x1b4   :  { %v1219_v58 = vadd.f32 %v1218_v36, %v1156_v9  ;;  %v1160_v9 = vmul.f32 %v3035_v53, %v3035_v53  ;;  %v3065_v53 = vsub.f32 %v3937_v63, %v2762_v7  ;;  %v3943_v63 = vld [vmem:[#allocation17_spill] sm:$0xff] }
 0x1b5   :  { %3933 = vst [vmem:[#allocation9_spill] sm:$0xff] %v3047_v31  ;;  %v3083_v56 = vsub.f32 %v3943_v63, %v2762_v7  ;;  %v3946_v63 = vld [vmem:[#allocation18_spill] sm:$0xff] }
 0x1b6   :  { %v1220_v51 = vadd.f32 %v1219_v58, %v1157_v14  ;;  %v3935_v58 = vld [vmem:[#allocation13_spill] sm:$0xff]  ;;  %3938 = vst [vmem:[#allocation11_spill] sm:$0xff] %v3065_v53 }
 0x1b7   :  { %v3059_v44 = vsub.f32 %v3935_v58, %v2762_v7  ;;  %v3941_v58 = vld [vmem:[#allocation15_spill] sm:$0xff] }
 0x1b8   :  { %v1221_v19 = vadd.f32 %v1220_v51, %v1158_v50  ;;  %v1162_v50 = vmul.f32 %v3047_v31, %v3047_v31  ;;  %v3077_v31 = vsub.f32 %v3941_v58, %v2762_v7  ;;  %v3945_v58 = vld [vmem:[#allocation16_spill] sm:$0xff] }
 0x1b9   :  { %3936 = vst [vmem:[#allocation13_spill] sm:$0xff] %v3059_v44 }
 0x1ba   :  { %v1222_v36 = vadd.f32 %v1221_v19, %v1159_v45  ;;  %v3939_v19 = vld [vmem:[#allocation12_spill] sm:$0xff]  ;;  %3942 = vst [vmem:[#allocation15_spill] sm:$0xff] %v3077_v31 }
 0x1bb   :  { %v3071_v0 = vsub.f32 %v3939_v19, %v2762_v7  ;;  %v3944_v19 = vld [vmem:[#allocation14_spill] sm:$0xff] }
 0x1bc   :  { %v1223_v14 = vadd.f32 %v1222_v36, %v1160_v9  ;;  %v1164_v9 = vmul.f32 %v3059_v44, %v3059_v44  ;;  %v3089_v44 = vsub.f32 %v3944_v19, %v2762_v7  ;;  %v3948_v19 = vld [vmem:[#allocation19_spill] sm:$0xff] }
 0x1bd   :  { %3940 = vst [vmem:[#allocation12_spill] sm:$0xff] %v3071_v0 }
 0x1be   :  { %v1224_v51 = vadd.f32 %v1223_v14, %v1161_v34  ;;  %v1165_v34 = vmul.f32 %v3065_v53, %v3065_v53  ;;  %v3095_v53 = vsub.f32 %v3945_v58, %v2762_v7  ;;  %v3113_v58 = vsub.f32 %v2732_v4, %v2762_v7 }
 0x1c0   :  { %v1225_v45 = vadd.f32 %v1224_v51, %v1162_v50  ;;  %v1166_v50 = vmul.f32 %v3071_v0, %v3071_v0  ;;  %v3101_v0 = vsub.f32 %v3946_v63, %v2762_v7  ;;  %3950 = vst [vmem:[#allocation16_spill] sm:$0xff] %v3113_v58  ;;  %v3119_v63 = vsub.f32 %v2740_v24, %v2762_v7 }
 0x1c2   :  { %v1226_v36 = vadd.f32 %v1225_v45, %v1163_v22  ;;  %v1167_v22 = vmul.f32 %v3077_v31, %v3077_v31  ;;  %3947 = vst [vmem:[#allocation17_spill] sm:$0xff] %v3101_v0  ;;  %v3107_v31 = vsub.f32 %v3948_v19, %v2762_v7  ;;  %3951 = vst [vmem:[#allocation18_spill] sm:$0xff] %v3119_v63 }
 0x1c3   :  { %v1111_v19 = vsub.f32 %v2752_v37, %v2762_v7  ;;  %v1176_v37 = vmul.f32 %v2765_v17, %v2765_v17 }
 0x1c4   :  { %v1227_v14 = vadd.f32 %v1226_v36, %v1164_v9  ;;  %v1168_v9 = vmul.f32 %v3083_v56, %v3083_v56  ;;  %3949 = vst [vmem:[#allocation14_spill] sm:$0xff] %v3107_v31 }
 0x1c5   :  { %v1175_v24 = vmul.f32 %v1111_v19, %v1111_v19 }
 0x1c6   :  { %v1228_v51 = vadd.f32 %v1227_v14, %v1165_v34  ;;  %v1169_v34 = vmul.f32 %v3089_v44, %v3089_v44 }
 0x1c8   :  { %v1229_v45 = vadd.f32 %v1228_v51, %v1166_v50  ;;  %v1170_v50 = vmul.f32 %v3095_v53, %v3095_v53 }
 0x1ca   :  { %v1230_v36 = vadd.f32 %v1229_v45, %v1167_v22  ;;  %v1171_v22 = vmul.f32 %v3101_v0, %v3101_v0 }
 0x1cc   :  { %v1231_v14 = vadd.f32 %v1230_v36, %v1168_v9  ;;  %v1172_v9 = vmul.f32 %v3107_v31, %v3107_v31 }
 0x1ce   :  { %v1232_v51 = vadd.f32 %v1231_v14, %v1169_v34  ;;  %v1173_v34 = vmul.f32 %v3113_v58, %v3113_v58  ;;  %v1174_v14 = vmul.f32 %v3119_v63, %v3119_v63 }
 0x1d0   :  { %v1233_v45 = vadd.f32 %v1232_v51, %v1170_v50  ;;  %v3131_v50 = vsub.f32 %v2748_v59, %v2762_v7 }
 0x1d2   :  { %v1234_v36 = vadd.f32 %v1233_v45, %v1171_v22  ;;  %v3135_v22 = vsub.f32 %v2756_v30, %v2762_v7  ;;  %v3146_v7 = vld [vmem:[%s3875_s2] ss:$0 sm:$0xff] }
 0x1d4   :  { %v1235_v4 = vadd.f32 %v1234_v36, %v1172_v9  ;;  %v1177_v9 = vmul.f32 %v3131_v50, %v3131_v50 }
 0x1d6   :  { %v1236_v0 = vadd.f32 %v1235_v4, %v1173_v34  ;;  %v1178_v34 = vmul.f32 %v3135_v22, %v3135_v22 }
 0x1d8   :  { %v1237_v51 = vadd.f32 %v1236_v0, %v1174_v14 }
 0x1da   :  { %v1238_v45 = vadd.f32 %v1237_v51, %v1175_v24  ;;  %v3149_v51 = vmul.f32 %v3146_v7, %v1111_v19  ;;  %v3169_v19 = vmul.f32 %v3146_v7, %v2785_v12  ;;  %v3189_v12 = vmul.f32 %v3146_v7, %v2813_v10 }
 0x1db   :  { %v3209_v10 = vmul.f32 %v3146_v7, %v2843_v2  ;;  %v3229_v2 = vmul.f32 %v3146_v7, %v2873_v52  ;;  %v3249_v52 = vmul.f32 %v3146_v7, %v2903_v55  ;;  %v3269_v55 = vmul.f32 %v3146_v7, %v2933_v6 }
 0x1dc   :  { %v1239_v36 = vadd.f32 %v1238_v45, %v1176_v37  ;;  %v3153_v37 = vmul.f32 %v3146_v7, %v2765_v17  ;;  %v3173_v17 = vmul.f32 %v3146_v7, %v2789_v39  ;;  %v3193_v39 = vmul.f32 %v3146_v7, %v2819_v15 }
 0x1dd   :  { %v3213_v15 = vmul.f32 %v3146_v7, %v2849_v29  ;;  %v3233_v29 = vmul.f32 %v3146_v7, %v2879_v43  ;;  %v3253_v43 = vmul.f32 %v3146_v7, %v2909_v60  ;;  %v3273_v60 = vmul.f32 %v3146_v7, %v2939_v13 }
 0x1de   :  { %v1240_v4 = vadd.f32 %v1239_v36, %v1177_v9  ;;  %v3289_v6 = vmul.f32 %v3146_v7, %v2963_v23  ;;  %v3293_v13 = vmul.f32 %v3146_v7, %v2969_v28  ;;  %v3952_v9 = vld [vmem:[#allocation20_spill] sm:$0xff]  ;;  %v3313_v28 = vmul.f32 %v3146_v7, %v2999_v47  ;;  %v3953_v36 = vld [vmem:[#allocation6_spill] sm:$0xff] }
 0x1df   :  { %v3309_v23 = vmul.f32 %v3146_v7, %v3952_v9  ;;  %v3961_v9 = vld [vmem:[#allocation22_spill] sm:$0xff] }
 0x1e0   :  { %v1241_v59 = vadd.f32 %v1240_v4, %v1178_v34  ;;  %v3954_v34 = vld [vmem:[#allocation8_spill] sm:$0xff]  ;;  %v3329_v4 = vmul.f32 %v3146_v7, %v3023_v42  ;;  %v3349_v42 = vmul.f32 %v3146_v7, %v3961_v9  ;;  %v3369_v9 = vmul.f32 %v3146_v7, %v3083_v56  ;;  %v3392_v56 = vld [vmem:[%s3876_s3] ss:$0 sm:$0xff]  ;;  %s2411_s3 = smov [#allocation3]  }
 0x1e1   :  { %s1844_s30 = sshll.u32 %s2411_s3, 4  ;;  %s3863_s30 = int_to_ptr.vmem [resolvable:$true] %s1844_s30 }
 0x1e2   :  { %v1242_v63 = vrot.slane %v1241_v59, 4  ;;  %s2388_s5 = scalar_lea.vmem %s3863_s30, 4096  ;;  %p2393_p1 = scmp.lt.s32.totalorder %s3863_s30, %s3863_s30 }
 0x1e3   :  { %p2389_p0 = scmp.ne.s32.totalorder %s3863_s30, %s2388_s5  ;;  %p2394_p2 = scmp.lt.s32.totalorder %s2388_s5, %s2388_s5 }
 0x1e4   :  { %v1243_v58 = vadd.f32 %v1242_v63, %v1241_v59  ;;  %v3157_v63 = vmul.f32 %v3146_v7, %v2769_v20  ;;  %v3177_v20 = vmul.f32 %v3146_v7, %v2795_v38  ;;  %v3197_v38 = vmul.f32 %v3146_v7, %v2825_v25  ;;  %v3955_v59 = vld [vmem:[#allocation7_spill] sm:$0xff] }
 0x1e5   :  { %v3217_v25 = vmul.f32 %v3146_v7, %v2855_v41  ;;  %v3237_v41 = vmul.f32 %v3146_v7, %v2885_v49  ;;  %v3257_v49 = vmul.f32 %v3146_v7, %v2915_v3  ;;  %v3277_v3 = vmul.f32 %v3146_v7, %v2945_v18  ;;  %p2395_p3 = por %p2394_p2, %p2393_p1 }
 0x1e6   :  { %v1244_v0 = vrot.slane %v1243_v58, 2  ;;  %v3297_v18 = vmul.f32 %v3146_v7, %v2975_v21  ;;  %v3317_v21 = vmul.f32 %v3146_v7, %v3953_v36  ;;  %v3333_v47 = vmul.f32 %v3146_v7, %v3955_v59  ;;  %v3962_v36 = vld [vmem:[#allocation13_spill] sm:$0xff]  ;;  %v3963_v59 = vld [vmem:[#allocation11_spill] sm:$0xff] }
 0x1e7   :  { %p2396_p4 = pnand %p2395_p3, %p2389_p0 }
 0x1e8   :  { %v1245_v14 = vadd.f32 %v1244_v0, %v1243_v58  ;;  %v3161_v58 = vmul.f32 %v3146_v7, %v2773_v27  ;;  %v3181_v27 = vmul.f32 %v3146_v7, %v2801_v40  ;;  %v3201_v40 = vmul.f32 %v3146_v7, %v2831_v32  ;;  %v3956_v0 = vld [vmem:[#allocation10_spill] sm:$0xff] }
 0x1e9   :  { %v3221_v32 = vmul.f32 %v3146_v7, %v2861_v35  ;;  %v3241_v35 = vmul.f32 %v3146_v7, %v2891_v57  ;;  %v3261_v57 = vmul.f32 %v3146_v7, %v2921_v8  ;;  %v3281_v8 = vmul.f32 %v3146_v7, %v2951_v11 }
 0x1ea   :  { %v1246_v31 = vrot.slane %v1245_v14, 1  ;;  %v3301_v11 = vmul.f32 %v3146_v7, %v2981_v26  ;;  %v3321_v26 = vmul.f32 %v3146_v7, %v3011_v5 }
 0x1ec   :  { %v1247_v30 = vadd.f32 %v1246_v31, %v1245_v14  ;;  %v3165_v31 = vmul.f32 %v3146_v7, %v2777_v61  ;;  %v3185_v61 = vmul.f32 %v3146_v7, %v2807_v54  ;;  %v3205_v54 = vmul.f32 %v3146_v7, %v2837_v48 }
 0x1ed   :  { %v3225_v48 = vmul.f32 %v3146_v7, %v2867_v46  ;;  %v3245_v46 = vmul.f32 %v3146_v7, %v2897_v62  ;;  %v3265_v62 = vmul.f32 %v3146_v7, %v2927_v1  ;;  %v3285_v1 = vmul.f32 %v3146_v7, %v2957_v16 }
 0x1ee   :  { %v1248_v24 = vmul.f32 0.001953125, %v1247_v30  ;;  %v3305_v16 = vmul.f32 %v3146_v7, %v2987_v33  ;;  %v3325_v33 = vmul.f32 %v3146_v7, %v3954_v34  ;;  %v3337_v14 = vmul.f32 %v3146_v7, %v3956_v0  ;;  %v3958_v30 = vld [vmem:[#allocation21_spill] sm:$0xff] }
 0x1ef   :  { %v3341_v5 = vmul.f32 %v3146_v7, %v3958_v30  ;;  %v3353_v34 = vmul.f32 %v3146_v7, %v3962_v36  ;;  %v3357_v0 = vmul.f32 %v3146_v7, %v3963_v59  ;;  %v3373_v36 = vmul.f32 %v3146_v7, %v3089_v44  ;;  %v3975_v44 = vld [vmem:[#allocation16_spill] sm:$0xff] }
 0x1f0   :  { %v1319_v45 = vadd.f32 1e-05, %v1248_v24  ;;  %3957 = vst [vmem:[#allocation19_spill] sm:$0xff] %v3337_v14  ;;  %v3960_v24 = vld [vmem:[#allocation9_spill] sm:$0xff]  ;;  %v3965_v14 = vld [vmem:[#allocation12_spill] sm:$0xff]  ;;  %v3377_v59 = vmul.f32 %v3146_v7, %v3095_v53  ;;  %v3976_v53 = vld [vmem:[#allocation18_spill] sm:$0xff] }
 0x1f1   :  { %3959 = vst [vmem:[#allocation20_spill] sm:$0xff] %v3341_v5  ;;  %3964 = vst [vmem:[#allocation6_spill] sm:$0xff] %v3357_v0  ;;  %v3361_v30 = vmul.f32 %v3146_v7, %v3965_v14  ;;  %v3967_v5 = vld [vmem:[#allocation15_spill] sm:$0xff]  ;;  %v3971_v0 = vld [vmem:[#allocation17_spill] sm:$0xff] }
 0x1f2   :  { %2386 = vrsqrt.f32 %v1319_v45  ;;  %v3345_v45 = vmul.f32 %v3146_v7, %v3960_v24  ;;  %v3365_v24 = vmul.f32 %v3146_v7, %v3967_v5  ;;  %3969 = vst [vmem:[#allocation10_spill] sm:$0xff] %v3373_v36  ;;  %3970 = vst [vmem:[#allocation21_spill] sm:$0xff] %v3377_v59  ;;  %v3381_v14 = vmul.f32 %v3146_v7, %v3971_v0 }
 0x1f3   :  { %3966 = vst [vmem:[#allocation8_spill] sm:$0xff] %v3361_v30  ;;  %v3973_v30 = vld [vmem:[#allocation14_spill] sm:$0xff]  ;;  %v3396_v36 = vmul.f32 %v3146_v7, %v3975_v44  ;;  %v3400_v59 = vmul.f32 %v3146_v7, %v3976_v53  ;;  %v3404_v0 = vmul.f32 %v3146_v7, %v3131_v50 }
 0x1f4   :  { %3968 = vst [vmem:[#allocation7_spill] sm:$0xff] %v3365_v24  ;;  %3972 = vst [vmem:[#allocation9_spill] sm:$0xff] %v3381_v14  ;;  %v3385_v5 = vmul.f32 %v3146_v7, %v3973_v30  ;;  %v3408_v30 = vmul.f32 %v3146_v7, %v3135_v22 }
 0x1f6   :  { %3974 = vst [vmem:[#allocation22_spill] sm:$0xff] %v3385_v5 }
 0x1ff   :  { %v3387_v24 = vpop.eup %2386 }
 0x200   :  { %v1381_v5 = vmul.f32 %v3387_v24, %v3149_v51  ;;  %v1382_v14 = vmul.f32 %v3387_v24, %v3153_v37  ;;  %v3416_v44 = vmul.f32 %v3387_v24, %v3157_v63  ;;  %v3420_v53 = vmul.f32 %v3387_v24, %v3161_v58 }
 0x201   :  { %v3424_v50 = vmul.f32 %v3387_v24, %v3165_v31  ;;  %v3428_v22 = vmul.f32 %v3387_v24, %v3169_v19  ;;  %v3432_v7 = vmul.f32 %v3387_v24, %v3173_v17  ;;  %v3436_v51 = vmul.f32 %v3387_v24, %v3177_v20 }
 0x202   :  { %v1451_v37 = vadd.f32 %v3392_v56, %v1381_v5  ;;  %v1452_v63 = vadd.f32 %v3392_v56, %v1382_v14  ;;  %v3442_v58 = vmul.f32 %v3387_v24, %v3181_v27  ;;  %v3446_v31 = vmul.f32 %v3387_v24, %v3185_v61 }
 0x203   :  { %v3450_v19 = vmul.f32 %v3387_v24, %v3189_v12  ;;  %v3454_v17 = vmul.f32 %v3387_v24, %v3193_v39  ;;  %v3458_v20 = vmul.f32 %v3387_v24, %v3197_v38  ;;  %v3462_v27 = vmul.f32 %v3387_v24, %v3201_v40 }
 0x204   :  { %v1515_v14 = vmax.f32 %v1451_v37, 0.0  ;;  %v1516_v5 = vmax.f32 %v1452_v63, 0.0  ;;  %v3466_v61 = vmul.f32 %v3387_v24, %v3205_v54  ;;  %v3470_v12 = vmul.f32 %v3387_v24, %v3209_v10 }
 0x205   :  { %v3474_v39 = vmul.f32 %v3387_v24, %v3213_v15  ;;  %v3478_v38 = vmul.f32 %v3387_v24, %v3217_v25  ;;  %v3482_v40 = vmul.f32 %v3387_v24, %v3221_v32  ;;  %v3486_v54 = vmul.f32 %v3387_v24, %v3225_v48 }
 0x206   :  { %v2204_v37 = vpack.c.bf16 %v1516_v5, %v1515_v14  ;;  %v3490_v10 = vmul.f32 %v3387_v24, %v3229_v2  ;;  %v3494_v15 = vmul.f32 %v3387_v24, %v3233_v29  ;;  %v3498_v25 = vmul.f32 %v3387_v24, %v3237_v41  ;;  %v3984_v5 = vld [vmem:[#allocation19_spill] sm:$0xff] }
 0x207   :  { %v3502_v32 = vmul.f32 %v3387_v24, %v3241_v35  ;;  %v3506_v48 = vmul.f32 %v3387_v24, %v3245_v46  ;;  %v3510_v2 = vmul.f32 %v3387_v24, %v3249_v52  ;;  %v3514_v29 = vmul.f32 %v3387_v24, %v3253_v43 }
 0x208   :  { %3977 = vst [vmem:[#allocation13_spill] sm:$0xff] %v3490_v10  ;;  %3978 = vst [vmem:[#allocation11_spill] sm:$0xff] %v3494_v15  ;;  %v1346_v41 = vmul.f32 %v3387_v24, %v3257_v49  ;;  %v1347_v35 = vmul.f32 %v3387_v24, %v3261_v57  ;;  %v1348_v63 = vmul.f32 %v3387_v24, %v3265_v62  ;;  %v3991_v15 = vld [vmem:[#allocation9_spill] sm:$0xff]  ;;  %v3992_v10 = vld [vmem:[#allocation22_spill] sm:$0xff] }
 0x209   :  { %3979 = vst [vmem:[#allocation12_spill] sm:$0xff] %v3498_v25  ;;  %3980 = vst [vmem:[#allocation15_spill] sm:$0xff] %v3502_v32  ;;  %v1349_v46 = vmul.f32 %v3387_v24, %v3269_v55  ;;  %v1350_v52 = vmul.f32 %v3387_v24, %v3273_v60  ;;  %v1351_v43 = vmul.f32 %v3387_v24, %v3277_v3  ;;  %v3989_v32 = vld [vmem:[#allocation10_spill] sm:$0xff]  ;;  %v3990_v25 = vld [vmem:[#allocation21_spill] sm:$0xff] }
 0x20a   :  { %3981 = vst [vmem:[#allocation17_spill] sm:$0xff] %v3506_v48  ;;  %3982 = vst [vmem:[#allocation14_spill] sm:$0xff] %v3510_v2  ;;  %v1352_v14 = vmul.f32 %v3387_v24, %v3281_v8  ;;  %v1353_v49 = vmul.f32 %v3387_v24, %v3285_v1  ;;  %v1354_v57 = vmul.f32 %v3387_v24, %v3289_v6  ;;  %v3987_v2 = vld [vmem:[#allocation8_spill] sm:$0xff]  ;;  %v3988_v48 = vld [vmem:[#allocation7_spill] sm:$0xff] }
 0x20b   :  { %3983 = vst [vmem:[#allocation16_spill] sm:$0xff] %v3514_v29  ;;  %2240 = vst [vmem:[#allocation3 + $0xf0] sm:$0xff] %v2204_v37   ;;  %v1355_v62 = vmul.f32 %v3387_v24, %v3293_v13  ;;  %v1356_v55 = vmul.f32 %v3387_v24, %v3297_v18  ;;  %v1357_v60 = vmul.f32 %v3387_v24, %v3301_v11  ;;  %v3985_v37 = vld [vmem:[#allocation20_spill] sm:$0xff]  ;;  %v3986_v29 = vld [vmem:[#allocation6_spill] sm:$0xff] }
 0x20c   :  { %v1358_v3 = vmul.f32 %v3387_v24, %v3305_v16  ;;  %v1359_v8 = vmul.f32 %v3387_v24, %v3309_v23  ;;  %v1360_v1 = vmul.f32 %v3387_v24, %v3313_v28  ;;  %v1361_v6 = vmul.f32 %v3387_v24, %v3317_v21 }
 0x20d   :  { %v1362_v13 = vmul.f32 %v3387_v24, %v3321_v26  ;;  %v1363_v18 = vmul.f32 %v3387_v24, %v3325_v33  ;;  %v1364_v11 = vmul.f32 %v3387_v24, %v3329_v4  ;;  %v1365_v16 = vmul.f32 %v3387_v24, %v3333_v47 }
 0x20e   :  { %v1366_v23 = vmul.f32 %v3387_v24, %v3984_v5  ;;  %v1367_v28 = vmul.f32 %v3387_v24, %v3985_v37  ;;  %v1368_v21 = vmul.f32 %v3387_v24, %v3345_v45  ;;  %v1369_v26 = vmul.f32 %v3387_v24, %v3349_v42 }
 0x20f   :  { %v1370_v33 = vmul.f32 %v3387_v24, %v3353_v34  ;;  %v1371_v4 = vmul.f32 %v3387_v24, %v3986_v29  ;;  %v1372_v47 = vmul.f32 %v3387_v24, %v3987_v2  ;;  %v1373_v5 = vmul.f32 %v3387_v24, %v3988_v48 }
 0x210   :  { %v1374_v37 = vmul.f32 %v3387_v24, %v3369_v9  ;;  %v1375_v45 = vmul.f32 %v3387_v24, %v3989_v32  ;;  %v1376_v42 = vmul.f32 %v3387_v24, %v3990_v25  ;;  %v1377_v34 = vmul.f32 %v3387_v24, %v3991_v15 }
 0x211   :  { %v1378_v29 = vmul.f32 %v3387_v24, %v3992_v10  ;;  %v1379_v2 = vmul.f32 %v3387_v24, %v3396_v36  ;;  %v1380_v48 = vmul.f32 %v3387_v24, %v3400_v59  ;;  %v1383_v9 = vmul.f32 %v3387_v24, %v3404_v0  ;;  %v4000_v10 = vld [vmem:[#allocation12_spill] sm:$0xff] }
 0x212   :  { %v1384_v32 = vmul.f32 %v3387_v24, %v3408_v30  ;;  %v3592_v25 = vadd.f32 %v3392_v56, %v3416_v44  ;;  %v3596_v15 = vadd.f32 %v3392_v56, %v3420_v53  ;;  %v3600_v36 = vadd.f32 %v3392_v56, %v3424_v50 }
 0x213   :  { %v3604_v59 = vadd.f32 %v3392_v56, %v3428_v22  ;;  %v3608_v0 = vadd.f32 %v3392_v56, %v3432_v7  ;;  %v3612_v24 = vadd.f32 %v3392_v56, %v3436_v51  ;;  %v3616_v30 = vadd.f32 %v3392_v56, %v3442_v58 }
 0x214   :  { %v3620_v44 = vadd.f32 %v3392_v56, %v3446_v31  ;;  %v3624_v53 = vadd.f32 %v3392_v56, %v3450_v19  ;;  %v3628_v50 = vadd.f32 %v3392_v56, %v3454_v17  ;;  %v3632_v22 = vadd.f32 %v3392_v56, %v3458_v20 }
 0x215   :  { %v3636_v7 = vadd.f32 %v3392_v56, %v3462_v27  ;;  %v3640_v51 = vadd.f32 %v3392_v56, %v3466_v61  ;;  %v3644_v58 = vadd.f32 %v3392_v56, %v3470_v12  ;;  %v3648_v31 = vadd.f32 %v3392_v56, %v3474_v39  ;;  %v3996_v27 = vld [vmem:[#allocation13_spill] sm:$0xff]  ;;  %v3998_v12 = vld [vmem:[#allocation11_spill] sm:$0xff] }
 0x216   :  { %v3652_v19 = vadd.f32 %v3392_v56, %v3478_v38  ;;  %v3656_v17 = vadd.f32 %v3392_v56, %v3482_v40  ;;  %v3660_v20 = vadd.f32 %v3392_v56, %v3486_v54  ;;  %v3664_v61 = vadd.f32 %v3392_v56, %v3996_v27 }
 0x217   :  { %v3668_v39 = vadd.f32 %v3392_v56, %v3998_v12  ;;  %v3672_v38 = vadd.f32 %v3392_v56, %v4000_v10  ;;  %v3694_v10 = vadd.f32 %v3392_v56, %v1347_v35  ;;  %v3715_v35 = vadd.f32 %v3392_v56, %v1354_v57 }
 0x218   :  { %3993 = vst [vmem:[#allocation18_spill] sm:$0xff] %v3652_v19  ;;  %3994 = vst [vmem:[#allocation19_spill] sm:$0xff] %v3656_v17  ;;  %v4001_v19 = vld [vmem:[#allocation15_spill] sm:$0xff]  ;;  %v4002_v17 = vld [vmem:[#allocation17_spill] sm:$0xff]  ;;  %v3736_v57 = vadd.f32 %v3392_v56, %v1361_v6  ;;  %v3757_v6 = vadd.f32 %v3392_v56, %v1368_v21  ;;  %v3778_v21 = vadd.f32 %v3392_v56, %v1375_v45 }
 0x219   :  { %3995 = vst [vmem:[#allocation20_spill] sm:$0xff] %v3660_v20  ;;  %3997 = vst [vmem:[#allocation6_spill] sm:$0xff] %v3664_v61  ;;  %v3676_v40 = vadd.f32 %v3392_v56, %v4001_v19  ;;  %v3680_v54 = vadd.f32 %v3392_v56, %v4002_v17  ;;  %v4004_v20 = vld [vmem:[#allocation14_spill] sm:$0xff]  ;;  %v4005_v61 = vld [vmem:[#allocation16_spill] sm:$0xff]  ;;  %v3697_v19 = vadd.f32 %v3392_v56, %v1348_v63 }
 0x21a   :  { %3999 = vst [vmem:[#allocation8_spill] sm:$0xff] %v3668_v39  ;;  %v3684_v27 = vadd.f32 %v3392_v56, %v4004_v20  ;;  %v3688_v12 = vadd.f32 %v3392_v56, %v4005_v61  ;;  %v3691_v39 = vadd.f32 %v3392_v56, %v1346_v41  ;;  %v3700_v17 = vadd.f32 %v3392_v56, %v1349_v46 }
 0x21b   :  { %4003 = vst [vmem:[#allocation7_spill] sm:$0xff] %v3680_v54  ;;  %v3703_v54 = vadd.f32 %v3392_v56, %v1350_v52  ;;  %v3706_v20 = vadd.f32 %v3392_v56, %v1351_v43  ;;  %v3709_v61 = vadd.f32 %v3392_v56, %v1352_v14  ;;  %v3712_v41 = vadd.f32 %v3392_v56, %v1353_v49 }
 0x21c   :  { %v3718_v63 = vadd.f32 %v3392_v56, %v1355_v62  ;;  %v3721_v46 = vadd.f32 %v3392_v56, %v1356_v55  ;;  %v3724_v52 = vadd.f32 %v3392_v56, %v1357_v60  ;;  %v3727_v43 = vadd.f32 %v3392_v56, %v1358_v3  ;;  %4006 = vst [vmem:[#allocation10_spill] sm:$0xff] %v3778_v21 }
 0x21d   :  { %v3730_v14 = vadd.f32 %v3392_v56, %v1359_v8  ;;  %v3733_v49 = vadd.f32 %v3392_v56, %v1360_v1  ;;  %v3739_v62 = vadd.f32 %v3392_v56, %v1362_v13  ;;  %v3742_v55 = vadd.f32 %v3392_v56, %v1363_v18 }
 0x21e   :  { %v3745_v60 = vadd.f32 %v3392_v56, %v1364_v11  ;;  %v3748_v3 = vadd.f32 %v3392_v56, %v1365_v16  ;;  %v3751_v8 = vadd.f32 %v3392_v56, %v1366_v23  ;;  %v3754_v1 = vadd.f32 %v3392_v56, %v1367_v28 }
 0x21f   :  { %v3760_v13 = vadd.f32 %v3392_v56, %v1369_v26  ;;  %v3763_v18 = vadd.f32 %v3392_v56, %v1370_v33  ;;  %v3766_v11 = vadd.f32 %v3392_v56, %v1371_v4  ;;  %v3769_v16 = vadd.f32 %v3392_v56, %v1372_v47 }
 0x220   :  { %v3772_v23 = vadd.f32 %v3392_v56, %v1373_v5  ;;  %v3775_v28 = vadd.f32 %v3392_v56, %v1374_v37  ;;  %v3781_v26 = vadd.f32 %v3392_v56, %v1376_v42  ;;  %v3784_v33 = vadd.f32 %v3392_v56, %v1377_v34 }
 0x221   :  { %v3787_v4 = vadd.f32 %v3392_v56, %v1378_v29  ;;  %v3790_v47 = vadd.f32 %v3392_v56, %v1379_v2  ;;  %v3793_v5 = vadd.f32 %v3392_v56, %v1380_v48  ;;  %v3796_v37 = vadd.f32 %v3392_v56, %v1383_v9 }
 0x222   :  { %4007 = vst [vmem:[#allocation21_spill] sm:$0xff] %v3781_v26  ;;  %4008 = vst [vmem:[#allocation9_spill] sm:$0xff] %v3784_v33  ;;  %v3799_v45 = vadd.f32 %v3392_v56, %v1384_v32  ;;  %v1455_v42 = vmax.f32 %v3592_v25, 0.0  ;;  %v1456_v34 = vmax.f32 %v3596_v15, 0.0  ;;  %v1457_v33 = vmax.f32 %v3600_v36, 0.0  ;;  %v4018_v26 = vld [vmem:[#allocation8_spill] sm:$0xff] }
 0x223   :  { %4009 = vst [vmem:[#allocation22_spill] sm:$0xff] %v3787_v4  ;;  %4010 = vst [vmem:[#allocation13_spill] sm:$0xff] %v3790_v47  ;;  %v1458_v29 = vmax.f32 %v3604_v59, 0.0  ;;  %v1459_v2 = vmax.f32 %v3608_v0, 0.0  ;;  %v1460_v47 = vmax.f32 %v3612_v24, 0.0  ;;  %v1461_v48 = vmax.f32 %v3616_v30, 0.0 }
 0x224   :  { %4011 = vst [vmem:[#allocation11_spill] sm:$0xff] %v3793_v5  ;;  %4012 = vst [vmem:[#allocation12_spill] sm:$0xff] %v3796_v37  ;;  %v1462_v9 = vmax.f32 %v3620_v44, 0.0  ;;  %v1463_v37 = vmax.f32 %v3624_v53, 0.0  ;;  %v1464_v56 = vmax.f32 %v3628_v50, 0.0  ;;  %v1465_v32 = vmax.f32 %v3632_v22, 0.0 }
 0x225   :  { %4013 = vst [vmem:[#allocation15_spill] sm:$0xff] %v3799_v45  ;;  %v1466_v25 = vmax.f32 %v3636_v7, 0.0  ;;  %v1467_v15 = vmax.f32 %v3640_v51, 0.0  ;;  %v1468_v36 = vmax.f32 %v3644_v58, 0.0  ;;  %v1469_v59 = vmax.f32 %v3648_v31, 0.0  ;;  %v4014_v0 = vld [vmem:[#allocation18_spill] sm:$0xff] }
 0x226   :  { %v1470_v24 = vmax.f32 %v4014_v0, 0.0  ;;  %v4015_v45 = vld [vmem:[#allocation19_spill] sm:$0xff]  ;;  %v4016_v5 = vld [vmem:[#allocation20_spill] sm:$0xff]  ;;  %v4017_v4 = vld [vmem:[#allocation6_spill] sm:$0xff]  ;;  %v1474_v50 = vmax.f32 %v4018_v26, 0.0  ;;  %v1475_v22 = vmax.f32 %v3672_v38, 0.0 }
 0x227   :  { %v1471_v30 = vmax.f32 %v4015_v45, 0.0  ;;  %v1472_v44 = vmax.f32 %v4016_v5, 0.0  ;;  %v1473_v53 = vmax.f32 %v4017_v4, 0.0  ;;  %v1476_v7 = vmax.f32 %v3676_v40, 0.0  ;;  %v4019_v21 = vld [vmem:[#allocation7_spill] sm:$0xff] }
 0x228   :  { %v1477_v51 = vmax.f32 %v4019_v21, 0.0  ;;  %v1478_v58 = vmax.f32 %v3684_v27, 0.0  ;;  %v1479_v31 = vmax.f32 %v3688_v12, 0.0  ;;  %v1480_v0 = vmax.f32 %v3691_v39, 0.0 }
 0x229   :  { %v1481_v45 = vmax.f32 %v3694_v10, 0.0  ;;  %v1482_v5 = vmax.f32 %v3697_v19, 0.0  ;;  %v1483_v4 = vmax.f32 %v3700_v17, 0.0  ;;  %v1484_v26 = vmax.f32 %v3703_v54, 0.0 }
 0x22a   :  { %v1485_v38 = vmax.f32 %v3706_v20, 0.0  ;;  %v1486_v40 = vmax.f32 %v3709_v61, 0.0  ;;  %v1487_v21 = vmax.f32 %v3712_v41, 0.0  ;;  %v1488_v27 = vmax.f32 %v3715_v35, 0.0 }
 0x22b   :  { %v1489_v12 = vmax.f32 %v3718_v63, 0.0  ;;  %v1490_v39 = vmax.f32 %v3721_v46, 0.0  ;;  %v1491_v10 = vmax.f32 %v3724_v52, 0.0  ;;  %v1492_v19 = vmax.f32 %v3727_v43, 0.0 }
 0x22c   :  { %v1493_v17 = vmax.f32 %v3730_v14, 0.0  ;;  %v1494_v54 = vmax.f32 %v3733_v49, 0.0  ;;  %v1495_v20 = vmax.f32 %v3736_v57, 0.0  ;;  %v1496_v61 = vmax.f32 %v3739_v62, 0.0 }
 0x22d   :  { %v1497_v41 = vmax.f32 %v3742_v55, 0.0  ;;  %v1498_v35 = vmax.f32 %v3745_v60, 0.0  ;;  %v1499_v63 = vmax.f32 %v3748_v3, 0.0  ;;  %v1500_v46 = vmax.f32 %v3751_v8, 0.0  ;;  %v4020_v3 = vld [vmem:[#allocation10_spill] sm:$0xff] }
 0x22e   :  { %v1501_v52 = vmax.f32 %v3754_v1, 0.0  ;;  %v1502_v43 = vmax.f32 %v3757_v6, 0.0  ;;  %v1503_v14 = vmax.f32 %v3760_v13, 0.0  ;;  %v1504_v49 = vmax.f32 %v3763_v18, 0.0  ;;  %v4021_v1 = vld [vmem:[#allocation21_spill] sm:$0xff] }
 0x22f   :  { %v1505_v57 = vmax.f32 %v3766_v11, 0.0  ;;  %v1506_v62 = vmax.f32 %v3769_v16, 0.0  ;;  %v1507_v55 = vmax.f32 %v3772_v23, 0.0  ;;  %v1508_v60 = vmax.f32 %v3775_v28, 0.0  ;;  %v4022_v13 = vld [vmem:[#allocation9_spill] sm:$0xff]  ;;  %v4023_v11 = vld [vmem:[#allocation22_spill] sm:$0xff] }
 0x230   :  { %v1509_v8 = vmax.f32 %v4020_v3, 0.0  ;;  %v1510_v6 = vmax.f32 %v4021_v1, 0.0  ;;  %v1511_v18 = vmax.f32 %v4022_v13, 0.0  ;;  %v1512_v16 = vmax.f32 %v4023_v11, 0.0  ;;  %v4024_v23 = vld [vmem:[#allocation13_spill] sm:$0xff]  ;;  %v4025_v3 = vld [vmem:[#allocation11_spill] sm:$0xff] }
 0x231   :  { %v1513_v28 = vmax.f32 %v4024_v23, 0.0  ;;  %v1514_v1 = vmax.f32 %v4025_v3, 0.0  ;;  %v4026_v13 = vld [vmem:[#allocation12_spill] sm:$0xff]  ;;  %v4027_v23 = vld [vmem:[#allocation15_spill] sm:$0xff] }
 0x232   :  { %v1517_v11 = vmax.f32 %v4026_v13, 0.0  ;;  %v1518_v3 = vmax.f32 %v4027_v23, 0.0  ;;  %v2054_v13 = vpack.c.bf16 %v1456_v34, %v1455_v42  ;;  %v2059_v23 = vpack.c.bf16 %v1458_v29, %v1457_v33 }
 0x233   :  { %v2064_v34 = vpack.c.bf16 %v1460_v47, %v1459_v2  ;;  %v2069_v42 = vpack.c.bf16 %v1462_v9, %v1461_v48  ;;  %v2074_v29 = vpack.c.bf16 %v1464_v56, %v1463_v37  ;;  %v2079_v33 = vpack.c.bf16 %v1466_v25, %v1465_v32 }
 0x234   :  { %v2084_v2 = vpack.c.bf16 %v1468_v36, %v1467_v15  ;;  %2055 = vst [vmem:[#allocation3] sm:$0xff] %v2054_v13   ;;  %2211 = vst [vmem:[#allocation3 + $0x8] sm:$0xff] %v2059_v23   ;;  %v2089_v47 = vpack.c.bf16 %v1470_v24, %v1469_v59  ;;  %v2094_v9 = vpack.c.bf16 %v1472_v44, %v1471_v30 }
 0x235   :  { %2212 = vst [vmem:[#allocation3 + $0x10] sm:$0xff] %v2064_v34   ;;  %v2099_v48 = vpack.c.bf16 %v1474_v50, %v1473_v53  ;;  %v2104_v37 = vpack.c.bf16 %v1476_v7, %v1475_v22  ;;  %2213 = vst [vmem:[#allocation3 + $0x18] sm:$0xff] %v2069_v42   ;;  %v2109_v56 = vpack.c.bf16 %v1478_v58, %v1477_v51 }
 0x236   :  { %2214 = vst [vmem:[#allocation3 + $0x20] sm:$0xff] %v2074_v29   ;;  %2215 = vst [vmem:[#allocation3 + $0x28] sm:$0xff] %v2079_v33   ;;  %v2114_v25 = vpack.c.bf16 %v1480_v0, %v1479_v31  ;;  %v2119_v32 = vpack.c.bf16 %v1482_v5, %v1481_v45  ;;  %v2124_v15 = vpack.c.bf16 %v1484_v26, %v1483_v4 }
 0x237   :  { %2216 = vst [vmem:[#allocation3 + $0x30] sm:$0xff] %v2084_v2   ;;  %2217 = vst [vmem:[#allocation3 + $0x38] sm:$0xff] %v2089_v47   ;;  %v2129_v36 = vpack.c.bf16 %v1486_v40, %v1485_v38  ;;  %v2134_v13 = vpack.c.bf16 %v1488_v27, %v1487_v21  ;;  %v2139_v59 = vpack.c.bf16 %v1490_v39, %v1489_v12 }
 0x238   :  { %2218 = vst [vmem:[#allocation3 + $0x40] sm:$0xff] %v2094_v9   ;;  %2219 = vst [vmem:[#allocation3 + $0x48] sm:$0xff] %v2099_v48   ;;  %v2144_v24 = vpack.c.bf16 %v1492_v19, %v1491_v10  ;;  %v2149_v30 = vpack.c.bf16 %v1494_v54, %v1493_v17  ;;  %v2154_v44 = vpack.c.bf16 %v1496_v61, %v1495_v20 }
 0x239   :  { %2220 = vst [vmem:[#allocation3 + $0x50] sm:$0xff] %v2104_v37   ;;  %2221 = vst [vmem:[#allocation3 + $0x58] sm:$0xff] %v2109_v56   ;;  %v2159_v53 = vpack.c.bf16 %v1498_v35, %v1497_v41  ;;  %v2164_v50 = vpack.c.bf16 %v1500_v46, %v1499_v63  ;;  %v2169_v22 = vpack.c.bf16 %v1502_v43, %v1501_v52 }
 0x23a   :  { %2222 = vst [vmem:[#allocation3 + $0x60] sm:$0xff] %v2114_v25   ;;  %2223 = vst [vmem:[#allocation3 + $0x68] sm:$0xff] %v2119_v32   ;;  %v2174_v7 = vpack.c.bf16 %v1504_v49, %v1503_v14  ;;  %v2179_v51 = vpack.c.bf16 %v1506_v62, %v1505_v57  ;;  %v2184_v58 = vpack.c.bf16 %v1508_v60, %v1507_v55 }
 0x23b   :  { %2224 = vst [vmem:[#allocation3 + $0x70] sm:$0xff] %v2124_v15   ;;  %2225 = vst [vmem:[#allocation3 + $0x78] sm:$0xff] %v2129_v36   ;;  %v2189_v31 = vpack.c.bf16 %v1510_v6, %v1509_v8  ;;  %v2194_v0 = vpack.c.bf16 %v1512_v16, %v1511_v18  ;;  %v2199_v45 = vpack.c.bf16 %v1514_v1, %v1513_v28 }
 0x23c   :  { %2226 = vst [vmem:[#allocation3 + $0x80] sm:$0xff] %v2134_v13   ;;  %2227 = vst [vmem:[#allocation3 + $0x88] sm:$0xff] %v2139_v59   ;;  %v2209_v5 = vpack.c.bf16 %v1518_v3, %v1517_v11 }
 0x23d   :  { %2228 = vst [vmem:[#allocation3 + $0x90] sm:$0xff] %v2144_v24   ;;  %2229 = vst [vmem:[#allocation3 + $0x98] sm:$0xff] %v2149_v30  }
 0x23e   :  { %2230 = vst [vmem:[#allocation3 + $0xa0] sm:$0xff] %v2154_v44   ;;  %2231 = vst [vmem:[#allocation3 + $0xa8] sm:$0xff] %v2159_v53  }
 0x23f   :  { %2232 = vst [vmem:[#allocation3 + $0xb0] sm:$0xff] %v2164_v50   ;;  %2233 = vst [vmem:[#allocation3 + $0xb8] sm:$0xff] %v2169_v22  }
 0x240   :  { %2234 = vst [vmem:[#allocation3 + $0xc0] sm:$0xff] %v2174_v7   ;;  %2235 = vst [vmem:[#allocation3 + $0xc8] sm:$0xff] %v2179_v51  }
 0x241   :  { %2236 = vst [vmem:[#allocation3 + $0xd0] sm:$0xff] %v2184_v58   ;;  %2237 = vst [vmem:[#allocation3 + $0xd8] sm:$0xff] %v2189_v31  }
 0x242   :  { %2238 = vst [vmem:[#allocation3 + $0xe0] sm:$0xff] %v2194_v0   ;;  %2239 = vst [vmem:[#allocation3 + $0xe8] sm:$0xff] %v2199_v45  }
 0x243   :  { %2241 = vst [vmem:[#allocation3 + $0xf8] sm:$0xff] %v2209_v5  }
 0x244   :  { %2399 = shalt.err (!%p2396_p4)
}
 0x245   :  { %s2412_s6 = smov 64   ;;  %s2413_s7 = smov 4  }
 0x246   :  { %1850 = dma.vmem_to_hbm [thread:$0]  %s3863_s30, 4096, %s3877_s4, [#allocation4], %s2412_s6, %s2412_s6, %s2413_s7  }
 0x247   :  { %2408 = dma.done.wait [#allocation4], 4096  }
 0x248   :  { %2409 = vsyncadd [#allocation4], 4294963200 }
 0x249   :  { %1854 = vsyncpa [#allocation4], 1 }

</bundles_post_ra>
